<compile_context>
chip_gen: v6e
topology: v6e:2x2x1
jax: 0.10.0
libtpu: 0.0.40
codegen_flags: <defaults>
</compile_context>

<pallas_src>
import functools

import jax
import jax.numpy as jnp
from jax import lax
from jax.experimental import pallas as pl
from jax.experimental.pallas import tpu as pltpu


LANE = 128      # channel dims are zero-padded up to a multiple of this
CB = 128        # channel block processed per grid step in the depthwise kernel


def _round_up(x, m):
    return (x + m - 1) // m * m


def _pick_row_tile(P, target=256):
    """Largest multiple of 8 that divides P and is <= target (row tile for (P,C))."""
    t = min(P, target)
    t -= t % 8
    while t >= 8:
        if P % t == 0:
            return t
        t -= 8
    return P


# ---------------------------------------------------------------------------
# Kernel 1: depthwise 7x7 conv for one (sample, 128-channel block), plus
# partial per-channel (sum, sum-of-squares) for the two-pass BatchNorm.
# Grid: (N, Cp // CB), both axes "parallel".
# ---------------------------------------------------------------------------
def dwconv_stats_kernel(xpad_ref, wdw_ref, y_ref, stat_ref):
    # xpad_ref: (H+6, W+6, CB) f32      wdw_ref: (49, 1, CB) f32
    # y_ref:    (H, W, CB)    bf16      stat_ref: (2, CB)    f32  (sum, sumsq)
    H, W, Cb = y_ref.shape

    def row_body(h, carry):
        s1, s2 = carry
        acc = jnp.zeros((W, Cb), jnp.float32)
        for kh in range(7):
            xrow = xpad_ref[h + kh]                     # (W+6, CB)
            for kw in range(7):
                acc = acc + xrow[kw:kw + W, :] * wdw_ref[kh * 7 + kw]
        y_ref[h] = acc.astype(y_ref.dtype)
        s1 = s1 + jnp.sum(acc, axis=0, keepdims=True)
        s2 = s2 + jnp.sum(acc * acc, axis=0, keepdims=True)
        return (s1, s2)

    s1, s2 = lax.fori_loop(
        0, H, row_body,
        (jnp.zeros((1, Cb), jnp.float32), jnp.zeros((1, Cb), jnp.float32)))
    stat_ref[0:1, :] = s1
    stat_ref[1:2, :] = s2


# ---------------------------------------------------------------------------
# Kernel 2 (projection shortcut only): per-row-tile partial (sum, sumsq) of
# s = x0 @ ws for the shortcut BatchNorm.  Grid: (P // TP,), "parallel".
# ---------------------------------------------------------------------------
def shortcut_stats_kernel(x0_ref, ws_ref, stat_ref):
    # x0_ref: (TP, Cp) bf16   ws_ref: (Cp, Coutp) bf16   stat_ref: (2, Coutp) f32
    s = jnp.dot(x0_ref[...], ws_ref[...], preferred_element_type=jnp.float32)
    stat_ref[0:1, :] = jnp.sum(s, axis=0, keepdims=True)
    stat_ref[1:2, :] = jnp.sum(s * s, axis=0, keepdims=True)


# ---------------------------------------------------------------------------
# Kernel 3: fused (BN1-folded) 1x1 expand + ReLU + 1x1 project (+bias)
# + shortcut.  Weights are resident (constant index_map); activations are
# tiled over P rows.  BN1 has been folded into w1/b1h; the shortcut BN has
# been folded into wsf/shs — the kernel is pure matmul + ReLU + adds.
# ---------------------------------------------------------------------------
def pw_fused_proj_kernel(y_ref, x0_ref, w1_ref, b1_ref, w2_ref, b2_ref,
                         wsf_ref, shs_ref, out_ref):
    h = jnp.dot(y_ref[...], w1_ref[...], preferred_element_type=jnp.float32)
    h = jnp.maximum(h + b1_ref[...], 0.0)
    z = jnp.dot(h.astype(jnp.bfloat16), w2_ref[...],
                preferred_element_type=jnp.float32) + b2_ref[...]
    s = jnp.dot(x0_ref[...], wsf_ref[...],
                preferred_element_type=jnp.float32) + shs_ref[...]
    out_ref[...] = (z + s).astype(out_ref.dtype)


def pw_fused_id_kernel(y_ref, x0_ref, w1_ref, b1_ref, w2_ref, b2_ref, out_ref):
    h = jnp.dot(y_ref[...], w1_ref[...], preferred_element_type=jnp.float32)
    h = jnp.maximum(h + b1_ref[...], 0.0)
    z = jnp.dot(h.astype(jnp.bfloat16), w2_ref[...],
                preferred_element_type=jnp.float32) + b2_ref[...]
    out_ref[...] = (z + x0_ref[...]).astype(out_ref.dtype)   # f32 residual


# ---------------------------------------------------------------------------
# Wrapper (layout glue: NCHW<->NHWC, channel padding, weight repacking + BN
# folding, tiny BN-stat reductions between passes)
# ---------------------------------------------------------------------------
def convnext_forward(x, p, inp_dim, output_dim, expansion):
    N, C, H, W = x.shape
    assert C == inp_dim
    hid = expansion * inp_dim
    f32, bf16 = jnp.float32, jnp.bfloat16

    Cp = _round_up(C, LANE)
    Hidp = _round_up(hid, LANE)
    Coutp = _round_up(output_dim, LANE)

    # NCHW -> NHWC (channels-last so 1x1 convs become lane-dense matmuls),
    # channel-pad to a lane multiple.
    x_nhwc = jnp.transpose(x, (0, 2, 3, 1)).astype(f32)
    if Cp != C:
        x_nhwc = jnp.pad(x_nhwc, ((0, 0), (0, 0), (0, 0), (0, Cp - C)))
    # TODO(synk): the 3-pixel halo could be handled inside the kernel with a
    # clamped index_map + boundary masks to avoid this extra padded copy.
    x_pad = jnp.pad(x_nhwc, ((0, 0), (3, 3), (3, 3), (0, 0)))

    # depthwise weight (C,1,7,7) -> (49, 1, Cp)
    wdw = jnp.transpose(p['w_dw'][:, 0], (1, 2, 0)).reshape(49, C)
    wdw = jnp.pad(wdw, ((0, 0), (0, Cp - C)))[:, None, :].astype(f32)

    # ------------------- pass 1: depthwise conv + BN stats -------------------
    n_cblk = Cp // CB
    y_conv, stats1 = pl.pallas_call(
        dwconv_stats_kernel,
        grid=(N, n_cblk),
        in_specs=[
            pl.BlockSpec((None, H + 6, W + 6, CB), lambda n, c: (n, 0, 0, c)),
            pl.BlockSpec((49, 1, CB), lambda n, c: (0, 0, c)),
        ],
        out_specs=(
            pl.BlockSpec((None, H, W, CB), lambda n, c: (n, 0, 0, c)),
            pl.BlockSpec((None, 2, CB), lambda n, c: (n, 0, c)),
        ),
        out_shape=(
            jax.ShapeDtypeStruct((N, H, W, Cp), bf16),
            jax.ShapeDtypeStruct((N, 2, Cp), f32),
        ),
        compiler_params=pltpu.CompilerParams(
            dimension_semantics=("parallel", "parallel")),
    )(x_pad, wdw)

    # Tiny reduction + fold BN1 into a per-channel scale/shift (train-mode,
    # biased variance, eps=1e-6) ... then fold *that* into the expand weights:
    #   relu((y*scale1+shift1) @ w1) == relu(y @ (scale1[:,None]*w1) + shift1@w1)
    cnt = jnp.float32(N * H * W)
    st = jnp.sum(stats1, axis=0)                         # (2, Cp)
    mean1 = st[0] / cnt
    var1 = jnp.maximum(st[1] / cnt - mean1 * mean1, 0.0)
    g1 = jnp.pad(p['g1'], (0, Cp - C))
    b1 = jnp.pad(p['b1'], (0, Cp - C))
    inv1 = lax.rsqrt(var1 + 1e-6)
    scale1 = g1 * inv1                                   # (Cp,)
    shift1 = b1 - mean1 * g1 * inv1                      # (Cp,)

    w1_f32 = jnp.transpose(p['w1'][:, :, 0, 0])          # (C, hid)
    w1_f32 = jnp.pad(w1_f32, ((0, Cp - C), (0, Hidp - hid)))
    w1_fold = (scale1[:, None] * w1_f32).astype(bf16)    # BN scale folded in
    b1h = (shift1[None, :] @ w1_f32).astype(f32)         # (1, Hidp) BN shift folded

    w2 = jnp.transpose(p['w2'][:, :, 0, 0])              # (hid, Cout)
    w2 = jnp.pad(w2, ((0, Hidp - hid), (0, Coutp - output_dim))).astype(bf16)
    b2 = jnp.pad(p['b2'], (0, Coutp - output_dim)).reshape(1, Coutp).astype(f32)

    # ---------------------- pass 2: fused pointwise path ---------------------
    P = N * H * W
    TP = _pick_row_tile(P)
    n_rows = P // TP
    y_flat = y_conv.reshape(P, Cp)                        # bf16

    row_spec = pl.BlockSpec((TP, Cp), lambda i: (i, 0))
    out_spec = pl.BlockSpec((TP, Coutp), lambda i: (i, 0))
    w1_spec = pl.BlockSpec((Cp, Hidp), lambda i: (0, 0))
    w2_spec = pl.BlockSpec((Hidp, Coutp), lambda i: (0, 0))
    ws_spec = pl.BlockSpec((Cp, Coutp), lambda i: (0, 0))
    vec_h_spec = pl.BlockSpec((1, Hidp), lambda i: (0, 0))
    vec_o_spec = pl.BlockSpec((1, Coutp), lambda i: (0, 0))

    if inp_dim != output_dim:
        x0_flat = x_nhwc.astype(bf16).reshape(P, Cp)      # matmul operand

        ws_f32 = jnp.transpose(p['ws'][:, :, 0, 0])       # (C, Cout)
        ws_f32 = jnp.pad(ws_f32, ((0, Cp - C), (0, Coutp - output_dim)))
        ws_bf = ws_f32.astype(bf16)

        # shortcut BN pass 1: partial stats of s = x0 @ ws per row tile
        stats_s = pl.pallas_call(
            shortcut_stats_kernel,
            grid=(n_rows,),
            in_specs=[row_spec, ws_spec],
            out_specs=pl.BlockSpec((None, 2, Coutp), lambda i: (i, 0, 0)),
            out_shape=jax.ShapeDtypeStruct((n_rows, 2, Coutp), f32),
            compiler_params=pltpu.CompilerParams(
                dimension_semantics=("parallel",)),
        )(x0_flat, ws_bf)

        sts = jnp.sum(stats_s, axis=0)                    # (2, Coutp)
        mean_s = sts[0] / jnp.float32(P)
        var_s = jnp.maximum(sts[1] / jnp.float32(P) - mean_s * mean_s, 0.0)
        g2 = jnp.pad(p['g2'], (0, Coutp - output_dim))
        b2n = jnp.pad(p['b2n'], (0, Coutp - output_dim))
        sc_s = g2 * lax.rsqrt(var_s + 1e-5)
        ws_fold = (ws_f32 * sc_s[None, :]).astype(bf16)   # fold BN scale into ws
        shift_s = (b2n - mean_s * sc_s).reshape(1, Coutp).astype(f32)

        out_flat = pl.pallas_call(
            pw_fused_proj_kernel,
            grid=(n_rows,),
            in_specs=[row_spec, row_spec, w1_spec, vec_h_spec,
                      w2_spec, vec_o_spec, ws_spec, vec_o_spec],
            out_specs=out_spec,
            out_shape=jax.ShapeDtypeStruct((P, Coutp), f32),
            compiler_params=pltpu.CompilerParams(
                dimension_semantics=("parallel",)),
        )(y_flat, x0_flat, w1_fold, b1h, w2, b2, ws_fold, shift_s)
    else:
        # identity shortcut: add the input in f32 (Cp == Coutp here)
        x0f_flat = x_nhwc.reshape(P, Cp)
        out_flat = pl.pallas_call(
            pw_fused_id_kernel,
            grid=(n_rows,),
            in_specs=[row_spec, row_spec, w1_spec, vec_h_spec,
                      w2_spec, vec_o_spec],
            out_specs=out_spec,
            out_shape=jax.ShapeDtypeStruct((P, Coutp), f32),
            compiler_params=pltpu.CompilerParams(
                dimension_semantics=("parallel",)),
        )(y_flat, x0f_flat, w1_fold, b1h, w2, b2)

    out = out_flat.reshape(N, H, W, Coutp)[..., :output_dim]
    return jnp.transpose(out, (0, 3, 1, 2))                # back to NCHW


# ---------------------------------------------------------------------------
# Pure-JAX reference (PyTorch semantics) for validation
# ---------------------------------------------------------------------------
def _bn_train_nchw(x, gamma, beta, eps):
    mean = jnp.mean(x, axis=(0, 2, 3), keepdims=True)
    var = jnp.mean((x - mean) ** 2, axis=(0, 2, 3), keepdims=True)
    return (x - mean) * lax.rsqrt(var + eps) * gamma[None, :, None, None] \
        + beta[None, :, None, None]


def reference(x, p, inp_dim, output_dim):
    dn = ('NCHW', 'OIHW', 'NCHW')
    y = lax.conv_general_dilated(x, p['w_dw'], (1, 1), ((3, 3), (3, 3)),
                                 feature_group_count=inp_dim,
                                 dimension_numbers=dn)
    y = _bn_train_nchw(y, p['g1'], p['b1'], 1e-6)
    y = lax.conv_general_dilated(y, p['w1'], (1, 1), 'VALID', dimension_numbers=dn)
    y = jnp.maximum(y, 0.0)
    y = lax.conv_general_dilated(y, p['w2'], (1, 1), 'VALID', dimension_numbers=dn)
    y = y + p['b2'][None, :, None, None]
    if inp_dim != output_dim:
        s = lax.conv_general_dilated(x, p['ws'], (1, 1), 'VALID',
                                     dimension_numbers=dn)
        s = _bn_train_nchw(s, p['g2'], p['b2n'], 1e-5)
    else:
        s = x
    return y + s


def init_params(key, inp_dim, output_dim, expansion):
    ks = jax.random.split(key, 9)
    hid = expansion * inp_dim
    p = {
        'w_dw': 0.2 * jax.random.normal(ks[0], (inp_dim, 1, 7, 7), jnp.float32),
        'g1': 1.0 + 0.1 * jax.random.normal(ks[1], (inp_dim,), jnp.float32),
        'b1': 0.1 * jax.random.normal(ks[2], (inp_dim,), jnp.float32),
        'w1': 0.3 * jax.random.normal(ks[3], (hid, inp_dim, 1, 1), jnp.float32),
        'w2': 0.3 * jax.random.normal(ks[4], (output_dim, hid, 1, 1), jnp.float32),
        'b2': 0.1 * jax.random.normal(ks[5], (output_dim,), jnp.float32),
    }
    if inp_dim != output_dim:
        p['ws'] = 0.3 * jax.random.normal(ks[6], (output_dim, inp_dim, 1, 1),
                                          jnp.float32)
        p['g2'] = 1.0 + 0.1 * jax.random.normal(ks[7], (output_dim,), jnp.float32)
        p['b2n'] = 0.1 * jax.random.normal(ks[8], (output_dim,), jnp.float32)
    return p


if __name__ == "__main__":
    key = jax.random.PRNGKey(0)
    N, H, W = 2, 16, 16
    expansion = 4
    k_x, k_p, k_x2, k_p2 = jax.random.split(key, 4)

    fwd = jax.jit(convnext_forward, static_argnums=(2, 3, 4))

    # Projection-shortcut configuration (inp_dim != output_dim)
    C_in, C_out = 4, 8
    x = jax.random.normal(k_x, (N, C_in, H, W), jnp.float32)
    params = init_params(k_p, C_in, C_out, expansion)
    out = jax.block_until_ready(fwd(x, params, C_in, C_out, expansion))
    ref = jax.block_until_ready(reference(x, params, C_in, C_out))
    assert out.shape == (N, C_out, H, W)
    err = float(jnp.max(jnp.abs(out - ref)))
    assert err < 5e-2, f"projection-shortcut mismatch vs reference: {err}"

    # Identity-shortcut configuration (inp_dim == output_dim)
    x2 = jax.random.normal(k_x2, (N, C_in, H, W), jnp.float32)
    params2 = init_params(k_p2, C_in, C_in, expansion)
    out2 = jax.block_until_ready(fwd(x2, params2, C_in, C_in, expansion))
    ref2 = jax.block_until_ready(reference(x2, params2, C_in, C_in))
    err2 = float(jnp.max(jnp.abs(out2 - ref2)))
    assert err2 < 5e-2, f"identity-shortcut mismatch vs reference: {err2}"

    print("KERNEL_OK")
</pallas_src>

<mosaic_0001>
module attributes {stable_mosaic.version = 11 : i64} {
  func.func @shortcut_stats_kernel(%arg0: i32, %arg1: memref<256x128xbf16, #tpu.memory_space<vmem>>, %arg2: memref<128x128xbf16, #tpu.memory_space<vmem>>, %arg3: memref<1x2x128xf32, #tpu.memory_space<vmem>>) attributes {dimension_semantics = [#tpu.dimension_semantics<parallel>], iteration_bounds = array<i64: 2>, scalar_prefetch = 0 : i64, scratch_operands = 0 : i64, tpu.core_type = #tpu.core_type<tc>, window_params = [{transform_indices = @transform_0, window_bounds = array<i64: 256, 128>}, {pipeline_mode = #tpu.pipeline_mode<synchronous>, transform_indices = @transform_1, window_bounds = array<i64: 128, 128>}, {transform_indices = @transform_2, window_bounds = array<i64: 1, 2, 128>}]} {
    %c0 = arith.constant 0 : index
    %c0_0 = arith.constant 0 : index
    %0 = vector.load %arg1[%c0, %c0_0] : memref<256x128xbf16, #tpu.memory_space<vmem>>, vector<256x128xbf16>
    %c0_1 = arith.constant 0 : index
    %c0_2 = arith.constant 0 : index
    %1 = vector.load %arg2[%c0_1, %c0_2] : memref<128x128xbf16, #tpu.memory_space<vmem>>, vector<128x128xbf16>
    %cst = arith.constant dense<0.000000e+00> : vector<256x128xf32>
    %2 = tpu.matmul %0, %1, %cst {dimension_numbers = #tpu.dot_dimension_numbers<[1], [0], [0], [1], [0, 0, 1, 1], [], []>} : vector<256x128xbf16>, vector<128x128xbf16>, vector<256x128xf32> -> vector<256x128xf32>
    %cst_3 = arith.constant dense<0.000000e+00> : vector<128xf32>
    %3 = vector.multi_reduction <add>, %2, %cst_3 [0] : vector<256x128xf32> to vector<128xf32>
    %4 = vector.shape_cast %3 : vector<128xf32> to vector<1x128xf32>
    %c0_4 = arith.constant 0 : index
    %c0_5 = arith.constant 0 : index
    %c0_6 = arith.constant 0 : index
    %5 = vector.load %arg3[%c0_4, %c0_5, %c0_6] : memref<1x2x128xf32, #tpu.memory_space<vmem>>, vector<1x1x128xf32>
    %6 = vector.shape_cast %5 : vector<1x1x128xf32> to vector<1x128xf32>
    %7 = vector.shape_cast %4 : vector<1x128xf32> to vector<1x1x128xf32>
    tpu.vector_store %arg3[%c0_4, %c0_5, %c0_6], %7 {strides = array<i32>} : memref<1x2x128xf32, #tpu.memory_space<vmem>>, vector<1x1x128xf32>,
    %8 = arith.mulf %2, %2 : vector<256x128xf32>
    %cst_7 = arith.constant dense<0.000000e+00> : vector<128xf32>
    %9 = vector.multi_reduction <add>, %8, %cst_7 [0] : vector<256x128xf32> to vector<128xf32>
    %10 = vector.shape_cast %9 : vector<128xf32> to vector<1x128xf32>
    %c0_8 = arith.constant 0 : index
    %c1 = arith.constant 1 : index
    %c0_9 = arith.constant 0 : index
    %11 = vector.load %arg3[%c0_8, %c1, %c0_9] : memref<1x2x128xf32, #tpu.memory_space<vmem>>, vector<1x1x128xf32>
    %12 = vector.shape_cast %11 : vector<1x1x128xf32> to vector<1x128xf32>
    %13 = vector.shape_cast %10 : vector<1x128xf32> to vector<1x1x128xf32>
    tpu.vector_store %arg3[%c0_8, %c1, %c0_9], %13 {strides = array<i32>} : memref<1x2x128xf32, #tpu.memory_space<vmem>>, vector<1x1x128xf32>,
    return
  }
  func.func @transform_0(%arg0: i32) -> (i32, i32) {
    %c0_i32 = arith.constant 0 : i32
    %c0_i32_0 = arith.constant 0 : i32
    return %arg0, %c0_i32 : i32, i32
  }
  func.func @transform_1(%arg0: i32) -> (i32, i32) {
    %c0_i32 = arith.constant 0 : i32
    %c0_i32_0 = arith.constant 0 : i32
    %c0_i32_1 = arith.constant 0 : i32
    return %c0_i32, %c0_i32_0 : i32, i32
  }
  func.func @transform_2(%arg0: i32) -> (i32, i32, i32) {
    %c0_i32 = arith.constant 0 : i32
    %c0_i32_0 = arith.constant 0 : i32
    %c0_i32_1 = arith.constant 0 : i32
    return %arg0, %c0_i32, %c0_i32_0 : i32, i32, i32
  }
}

module attributes {stable_mosaic.version = 11 : i64} {
  func.func @dwconv_stats_kernel(%arg0: i32, %arg1: i32, %arg2: memref<1x22x22x128xf32, #tpu.memory_space<vmem>>, %arg3: memref<49x1x128xf32, #tpu.memory_space<vmem>>, %arg4: memref<1x16x16x128xbf16, #tpu.memory_space<vmem>>, %arg5: memref<1x2x128xf32, #tpu.memory_space<vmem>>) attributes {dimension_semantics = [#tpu.dimension_semantics<parallel>, #tpu.dimension_semantics<parallel>], iteration_bounds = array<i64: 2, 1>, scalar_prefetch = 0 : i64, scratch_operands = 0 : i64, tpu.core_type = #tpu.core_type<tc>, window_params = [{transform_indices = @transform_0, window_bounds = array<i64: 1, 22, 22, 128>}, {transform_indices = @transform_1, window_bounds = array<i64: 49, 1, 128>}, {transform_indices = @transform_2, window_bounds = array<i64: 1, 16, 16, 128>}, {transform_indices = @transform_3, window_bounds = array<i64: 1, 2, 128>}]} {
    %cst = arith.constant 0.000000e+00 : f32
    %0 = vector.broadcast %cst : f32 to vector<1x128xf32>
    %cst_0 = arith.constant 0.000000e+00 : f32
    %1 = vector.broadcast %cst_0 : f32 to vector<1x128xf32>
    %c0_i32 = arith.constant 0 : i32
    %c16_i32 = arith.constant 16 : i32
    %2 = arith.addi %c0_i32, %c16_i32 : i32
    %c1_i32 = arith.constant 1 : i32
    %3:2 = scf.for %arg6 = %c0_i32 to %2 step %c1_i32 iter_args(%arg7 = %0, %arg8 = %1) -> (vector<1x128xf32>, vector<1x128xf32>)  : i32 {
      %cst_6 = arith.constant 0.000000e+00 : f32
      %10 = vector.broadcast %cst_6 : f32 to vector<16x128xf32>
      %c0_i32_7 = arith.constant 0 : i32
      %11 = arith.addi %arg6, %c0_i32_7 : i32
      %c0_8 = arith.constant 0 : index
      %12 = arith.index_cast %11 : i32 to index
      %c0_9 = arith.constant 0 : index
      %c0_10 = arith.constant 0 : index
      %13 = vector.load %arg2[%c0_8, %12, %c0_9, %c0_10] : memref<1x22x22x128xf32, #tpu.memory_space<vmem>>, vector<1x1x22x128xf32>
      %14 = vector.shape_cast %13 : vector<1x1x22x128xf32> to vector<22x128xf32>
      %15 = vector.extract_strided_slice %14 {offsets = [0, 0], sizes = [16, 128], strides = [1, 1]} : vector<22x128xf32> to vector<16x128xf32>
      %c0_11 = arith.constant 0 : index
      %c0_12 = arith.constant 0 : index
      %c0_13 = arith.constant 0 : index
      %16 = vector.load %arg3[%c0_11, %c0_12, %c0_13] : memref<49x1x128xf32, #tpu.memory_space<vmem>>, vector<1x1x128xf32>
      %17 = vector.shape_cast %16 : vector<1x1x128xf32> to vector<1x128xf32>
      %18 = vector.broadcast %17 : vector<1x128xf32> to vector<16x128xf32>
      %19 = arith.mulf %15, %18 : vector<16x128xf32>
      %20 = arith.addf %10, %19 : vector<16x128xf32>
      %21 = vector.extract_strided_slice %14 {offsets = [1, 0], sizes = [16, 128], strides = [1, 1]} : vector<22x128xf32> to vector<16x128xf32>
      %c1_14 = arith.constant 1 : index
      %c0_15 = arith.constant 0 : index
      %c0_16 = arith.constant 0 : index
      %22 = vector.load %arg3[%c1_14, %c0_15, %c0_16] : memref<49x1x128xf32, #tpu.memory_space<vmem>>, vector<1x1x128xf32>
      %23 = vector.shape_cast %22 : vector<1x1x128xf32> to vector<1x128xf32>
      %24 = vector.broadcast %23 : vector<1x128xf32> to vector<16x128xf32>
      %25 = arith.mulf %21, %24 : vector<16x128xf32>
      %26 = arith.addf %20, %25 : vector<16x128xf32>
      %27 = vector.extract_strided_slice %14 {offsets = [2, 0], sizes = [16, 128], strides = [1, 1]} : vector<22x128xf32> to vector<16x128xf32>
      %c2 = arith.constant 2 : index
      %c0_17 = arith.constant 0 : index
      %c0_18 = arith.constant 0 : index
      %28 = vector.load %arg3[%c2, %c0_17, %c0_18] : memref<49x1x128xf32, #tpu.memory_space<vmem>>, vector<1x1x128xf32>
      %29 = vector.shape_cast %28 : vector<1x1x128xf32> to vector<1x128xf32>
      %30 = vector.broadcast %29 : vector<1x128xf32> to vector<16x128xf32>
      %31 = arith.mulf %27, %30 : vector<16x128xf32>
      %32 = arith.addf %26, %31 : vector<16x128xf32>
      %33 = vector.extract_strided_slice %14 {offsets = [3, 0], sizes = [16, 128], strides = [1, 1]} : vector<22x128xf32> to vector<16x128xf32>
      %c3 = arith.constant 3 : index
      %c0_19 = arith.constant 0 : index
      %c0_20 = arith.constant 0 : index
      %34 = vector.load %arg3[%c3, %c0_19, %c0_20] : memref<49x1x128xf32, #tpu.memory_space<vmem>>, vector<1x1x128xf32>
      %35 = vector.shape_cast %34 : vector<1x1x128xf32> to vector<1x128xf32>
      %36 = vector.broadcast %35 : vector<1x128xf32> to vector<16x128xf32>
      %37 = arith.mulf %33, %36 : vector<16x128xf32>
      %38 = arith.addf %32, %37 : vector<16x128xf32>
      %39 = vector.extract_strided_slice %14 {offsets = [4, 0], sizes = [16, 128], strides = [1, 1]} : vector<22x128xf32> to vector<16x128xf32>
      %c4 = arith.constant 4 : index
      %c0_21 = arith.constant 0 : index
      %c0_22 = arith.constant 0 : index
      %40 = vector.load %arg3[%c4, %c0_21, %c0_22] : memref<49x1x128xf32, #tpu.memory_space<vmem>>, vector<1x1x128xf32>
      %41 = vector.shape_cast %40 : vector<1x1x128xf32> to vector<1x128xf32>
      %42 = vector.broadcast %41 : vector<1x128xf32> to vector<16x128xf32>
      %43 = arith.mulf %39, %42 : vector<16x128xf32>
      %44 = arith.addf %38, %43 : vector<16x128xf32>
      %45 = vector.extract_strided_slice %14 {offsets = [5, 0], sizes = [16, 128], strides = [1, 1]} : vector<22x128xf32> to vector<16x128xf32>
      %c5 = arith.constant 5 : index
      %c0_23 = arith.constant 0 : index
      %c0_24 = arith.constant 0 : index
      %46 = vector.load %arg3[%c5, %c0_23, %c0_24] : memref<49x1x128xf32, #tpu.memory_space<vmem>>, vector<1x1x128xf32>
      %47 = vector.shape_cast %46 : vector<1x1x128xf32> to vector<1x128xf32>
      %48 = vector.broadcast %47 : vector<1x128xf32> to vector<16x128xf32>
      %49 = arith.mulf %45, %48 : vector<16x128xf32>
      %50 = arith.addf %44, %49 : vector<16x128xf32>
      %51 = vector.extract_strided_slice %14 {offsets = [6, 0], sizes = [16, 128], strides = [1, 1]} : vector<22x128xf32> to vector<16x128xf32>
      %c6 = arith.constant 6 : index
      %c0_25 = arith.constant 0 : index
      %c0_26 = arith.constant 0 : index
      %52 = vector.load %arg3[%c6, %c0_25, %c0_26] : memref<49x1x128xf32, #tpu.memory_space<vmem>>, vector<1x1x128xf32>
      %53 = vector.shape_cast %52 : vector<1x1x128xf32> to vector<1x128xf32>
      %54 = vector.broadcast %53 : vector<1x128xf32> to vector<16x128xf32>
      %55 = arith.mulf %51, %54 : vector<16x128xf32>
      %56 = arith.addf %50, %55 : vector<16x128xf32>
      %c1_i32_27 = arith.constant 1 : i32
      %57 = arith.addi %arg6, %c1_i32_27 : i32
      %c0_28 = arith.constant 0 : index
      %58 = arith.index_cast %57 : i32 to index
      %c0_29 = arith.constant 0 : index
      %c0_30 = arith.constant 0 : index
      %59 = vector.load %arg2[%c0_28, %58, %c0_29, %c0_30] : memref<1x22x22x128xf32, #tpu.memory_space<vmem>>, vector<1x1x22x128xf32>
      %60 = vector.shape_cast %59 : vector<1x1x22x128xf32> to vector<22x128xf32>
      %61 = vector.extract_strided_slice %60 {offsets = [0, 0], sizes = [16, 128], strides = [1, 1]} : vector<22x128xf32> to vector<16x128xf32>
      %c7 = arith.constant 7 : index
      %c0_31 = arith.constant 0 : index
      %c0_32 = arith.constant 0 : index
      %62 = vector.load %arg3[%c7, %c0_31, %c0_32] : memref<49x1x128xf32, #tpu.memory_space<vmem>>, vector<1x1x128xf32>
      %63 = vector.shape_cast %62 : vector<1x1x128xf32> to vector<1x128xf32>
      %64 = vector.broadcast %63 : vector<1x128xf32> to vector<16x128xf32>
      %65 = arith.mulf %61, %64 : vector<16x128xf32>
      %66 = arith.addf %56, %65 : vector<16x128xf32>
      %67 = vector.extract_strided_slice %60 {offsets = [1, 0], sizes = [16, 128], strides = [1, 1]} : vector<22x128xf32> to vector<16x128xf32>
      %c8 = arith.constant 8 : index
      %c0_33 = arith.constant 0 : index
      %c0_34 = arith.constant 0 : index
      %68 = vector.load %arg3[%c8, %c0_33, %c0_34] : memref<49x1x128xf32, #tpu.memory_space<vmem>>, vector<1x1x128xf32>
      %69 = vector.shape_cast %68 : vector<1x1x128xf32> to vector<1x128xf32>
      %70 = vector.broadcast %69 : vector<1x128xf32> to vector<16x128xf32>
      %71 = arith.mulf %67, %70 : vector<16x128xf32>
      %72 = arith.addf %66, %71 : vector<16x128xf32>
      %73 = vector.extract_strided_slice %60 {offsets = [2, 0], sizes = [16, 128], strides = [1, 1]} : vector<22x128xf32> to vector<16x128xf32>
      %c9 = arith.constant 9 : index
      %c0_35 = arith.constant 0 : index
      %c0_36 = arith.constant 0 : index
      %74 = vector.load %arg3[%c9, %c0_35, %c0_36] : memref<49x1x128xf32, #tpu.memory_space<vmem>>, vector<1x1x128xf32>
      %75 = vector.shape_cast %74 : vector<1x1x128xf32> to vector<1x128xf32>
      %76 = vector.broadcast %75 : vector<1x128xf32> to vector<16x128xf32>
      %77 = arith.mulf %73, %76 : vector<16x128xf32>
      %78 = arith.addf %72, %77 : vector<16x128xf32>
      %79 = vector.extract_strided_slice %60 {offsets = [3, 0], sizes = [16, 128], strides = [1, 1]} : vector<22x128xf32> to vector<16x128xf32>
      %c10 = arith.constant 10 : index
      %c0_37 = arith.constant 0 : index
      %c0_38 = arith.constant 0 : index
      %80 = vector.load %arg3[%c10, %c0_37, %c0_38] : memref<49x1x128xf32, #tpu.memory_space<vmem>>, vector<1x1x128xf32>
      %81 = vector.shape_cast %80 : vector<1x1x128xf32> to vector<1x128xf32>
      %82 = vector.broadcast %81 : vector<1x128xf32> to vector<16x128xf32>
      %83 = arith.mulf %79, %82 : vector<16x128xf32>
      %84 = arith.addf %78, %83 : vector<16x128xf32>
      %85 = vector.extract_strided_slice %60 {offsets = [4, 0], sizes = [16, 128], strides = [1, 1]} : vector<22x128xf32> to vector<16x128xf32>
      %c11 = arith.constant 11 : index
      %c0_39 = arith.constant 0 : index
      %c0_40 = arith.constant 0 : index
      %86 = vector.load %arg3[%c11, %c0_39, %c0_40] : memref<49x1x128xf32, #tpu.memory_space<vmem>>, vector<1x1x128xf32>
      %87 = vector.shape_cast %86 : vector<1x1x128xf32> to vector<1x128xf32>
      %88 = vector.broadcast %87 : vector<1x128xf32> to vector<16x128xf32>
      %89 = arith.mulf %85, %88 : vector<16x128xf32>
      %90 = arith.addf %84, %89 : vector<16x128xf32>
      %91 = vector.extract_strided_slice %60 {offsets = [5, 0], sizes = [16, 128], strides = [1, 1]} : vector<22x128xf32> to vector<16x128xf32>
      %c12 = arith.constant 12 : index
      %c0_41 = arith.constant 0 : index
      %c0_42 = arith.constant 0 : index
      %92 = vector.load %arg3[%c12, %c0_41, %c0_42] : memref<49x1x128xf32, #tpu.memory_space<vmem>>, vector<1x1x128xf32>
      %93 = vector.shape_cast %92 : vector<1x1x128xf32> to vector<1x128xf32>
      %94 = vector.broadcast %93 : vector<1x128xf32> to vector<16x128xf32>
      %95 = arith.mulf %91, %94 : vector<16x128xf32>
      %96 = arith.addf %90, %95 : vector<16x128xf32>
      %97 = vector.extract_strided_slice %60 {offsets = [6, 0], sizes = [16, 128], strides = [1, 1]} : vector<22x128xf32> to vector<16x128xf32>
      %c13 = arith.constant 13 : index
      %c0_43 = arith.constant 0 : index
      %c0_44 = arith.constant 0 : index
      %98 = vector.load %arg3[%c13, %c0_43, %c0_44] : memref<49x1x128xf32, #tpu.memory_space<vmem>>, vector<1x1x128xf32>
      %99 = vector.shape_cast %98 : vector<1x1x128xf32> to vector<1x128xf32>
      %100 = vector.broadcast %99 : vector<1x128xf32> to vector<16x128xf32>
      %101 = arith.mulf %97, %100 : vector<16x128xf32>
      %102 = arith.addf %96, %101 : vector<16x128xf32>
      %c2_i32 = arith.constant 2 : i32
      %103 = arith.addi %arg6, %c2_i32 : i32
      %c0_45 = arith.constant 0 : index
      %104 = arith.index_cast %103 : i32 to index
      %c0_46 = arith.constant 0 : index
      %c0_47 = arith.constant 0 : index
      %105 = vector.load %arg2[%c0_45, %104, %c0_46, %c0_47] : memref<1x22x22x128xf32, #tpu.memory_space<vmem>>, vector<1x1x22x128xf32>
      %106 = vector.shape_cast %105 : vector<1x1x22x128xf32> to vector<22x128xf32>
      %107 = vector.extract_strided_slice %106 {offsets = [0, 0], sizes = [16, 128], strides = [1, 1]} : vector<22x128xf32> to vector<16x128xf32>
      %c14 = arith.constant 14 : index
      %c0_48 = arith.constant 0 : index
      %c0_49 = arith.constant 0 : index
      %108 = vector.load %arg3[%c14, %c0_48, %c0_49] : memref<49x1x128xf32, #tpu.memory_space<vmem>>, vector<1x1x128xf32>
      %109 = vector.shape_cast %108 : vector<1x1x128xf32> to vector<1x128xf32>
      %110 = vector.broadcast %109 : vector<1x128xf32> to vector<16x128xf32>
      %111 = arith.mulf %107, %110 : vector<16x128xf32>
      %112 = arith.addf %102, %111 : vector<16x128xf32>
      %113 = vector.extract_strided_slice %106 {offsets = [1, 0], sizes = [16, 128], strides = [1, 1]} : vector<22x128xf32> to vector<16x128xf32>
      %c15 = arith.constant 15 : index
      %c0_50 = arith.constant 0 : index
      %c0_51 = arith.constant 0 : index
      %114 = vector.load %arg3[%c15, %c0_50, %c0_51] : memref<49x1x128xf32, #tpu.memory_space<vmem>>, vector<1x1x128xf32>
      %115 = vector.shape_cast %114 : vector<1x1x128xf32> to vector<1x128xf32>
      %116 = vector.broadcast %115 : vector<1x128xf32> to vector<16x128xf32>
      %117 = arith.mulf %113, %116 : vector<16x128xf32>
      %118 = arith.addf %112, %117 : vector<16x128xf32>
      %119 = vector.extract_strided_slice %106 {offsets = [2, 0], sizes = [16, 128], strides = [1, 1]} : vector<22x128xf32> to vector<16x128xf32>
      %c16 = arith.constant 16 : index
      %c0_52 = arith.constant 0 : index
      %c0_53 = arith.constant 0 : index
      %120 = vector.load %arg3[%c16, %c0_52, %c0_53] : memref<49x1x128xf32, #tpu.memory_space<vmem>>, vector<1x1x128xf32>
      %121 = vector.shape_cast %120 : vector<1x1x128xf32> to vector<1x128xf32>
      %122 = vector.broadcast %121 : vector<1x128xf32> to vector<16x128xf32>
      %123 = arith.mulf %119, %122 : vector<16x128xf32>
      %124 = arith.addf %118, %123 : vector<16x128xf32>
      %125 = vector.extract_strided_slice %106 {offsets = [3, 0], sizes = [16, 128], strides = [1, 1]} : vector<22x128xf32> to vector<16x128xf32>
      %c17 = arith.constant 17 : index
      %c0_54 = arith.constant 0 : index
      %c0_55 = arith.constant 0 : index
      %126 = vector.load %arg3[%c17, %c0_54, %c0_55] : memref<49x1x128xf32, #tpu.memory_space<vmem>>, vector<1x1x128xf32>
      %127 = vector.shape_cast %126 : vector<1x1x128xf32> to vector<1x128xf32>
      %128 = vector.broadcast %127 : vector<1x128xf32> to vector<16x128xf32>
      %129 = arith.mulf %125, %128 : vector<16x128xf32>
      %130 = arith.addf %124, %129 : vector<16x128xf32>
      %131 = vector.extract_strided_slice %106 {offsets = [4, 0], sizes = [16, 128], strides = [1, 1]} : vector<22x128xf32> to vector<16x128xf32>
      %c18 = arith.constant 18 : index
      %c0_56 = arith.constant 0 : index
      %c0_57 = arith.constant 0 : index
      %132 = vector.load %arg3[%c18, %c0_56, %c0_57] : memref<49x1x128xf32, #tpu.memory_space<vmem>>, vector<1x1x128xf32>
      %133 = vector.shape_cast %132 : vector<1x1x128xf32> to vector<1x128xf32>
      %134 = vector.broadcast %133 : vector<1x128xf32> to vector<16x128xf32>
      %135 = arith.mulf %131, %134 : vector<16x128xf32>
      %136 = arith.addf %130, %135 : vector<16x128xf32>
      %137 = vector.extract_strided_slice %106 {offsets = [5, 0], sizes = [16, 128], strides = [1, 1]} : vector<22x128xf32> to vector<16x128xf32>
      %c19 = arith.constant 19 : index
      %c0_58 = arith.constant 0 : index
      %c0_59 = arith.constant 0 : index
      %138 = vector.load %arg3[%c19, %c0_58, %c0_59] : memref<49x1x128xf32, #tpu.memory_space<vmem>>, vector<1x1x128xf32>
      %139 = vector.shape_cast %138 : vector<1x1x128xf32> to vector<1x128xf32>
      %140 = vector.broadcast %139 : vector<1x128xf32> to vector<16x128xf32>
      %141 = arith.mulf %137, %140 : vector<16x128xf32>
      %142 = arith.addf %136, %141 : vector<16x128xf32>
      %143 = vector.extract_strided_slice %106 {offsets = [6, 0], sizes = [16, 128], strides = [1, 1]} : vector<22x128xf32> to vector<16x128xf32>
      %c20 = arith.constant 20 : index
      %c0_60 = arith.constant 0 : index
      %c0_61 = arith.constant 0 : index
      %144 = vector.load %arg3[%c20, %c0_60, %c0_61] : memref<49x1x128xf32, #tpu.memory_space<vmem>>, vector<1x1x128xf32>
      %145 = vector.shape_cast %144 : vector<1x1x128xf32> to vector<1x128xf32>
      %146 = vector.broadcast %145 : vector<1x128xf32> to vector<16x128xf32>
      %147 = arith.mulf %143, %146 : vector<16x128xf32>
      %148 = arith.addf %142, %147 : vector<16x128xf32>
      %c3_i32 = arith.constant 3 : i32
      %149 = arith.addi %arg6, %c3_i32 : i32
      %c0_62 = arith.constant 0 : index
      %150 = arith.index_cast %149 : i32 to index
      %c0_63 = arith.constant 0 : index
      %c0_64 = arith.constant 0 : index
      %151 = vector.load %arg2[%c0_62, %150, %c0_63, %c0_64] : memref<1x22x22x128xf32, #tpu.memory_space<vmem>>, vector<1x1x22x128xf32>
      %152 = vector.shape_cast %151 : vector<1x1x22x128xf32> to vector<22x128xf32>
      %153 = vector.extract_strided_slice %152 {offsets = [0, 0], sizes = [16, 128], strides = [1, 1]} : vector<22x128xf32> to vector<16x128xf32>
      %c21 = arith.constant 21 : index
      %c0_65 = arith.constant 0 : index
      %c0_66 = arith.constant 0 : index
      %154 = vector.load %arg3[%c21, %c0_65, %c0_66] : memref<49x1x128xf32, #tpu.memory_space<vmem>>, vector<1x1x128xf32>
      %155 = vector.shape_cast %154 : vector<1x1x128xf32> to vector<1x128xf32>
      %156 = vector.broadcast %155 : vector<1x128xf32> to vector<16x128xf32>
      %157 = arith.mulf %153, %156 : vector<16x128xf32>
      %158 = arith.addf %148, %157 : vector<16x128xf32>
      %159 = vector.extract_strided_slice %152 {offsets = [1, 0], sizes = [16, 128], strides = [1, 1]} : vector<22x128xf32> to vector<16x128xf32>
      %c22 = arith.constant 22 : index
      %c0_67 = arith.constant 0 : index
      %c0_68 = arith.constant 0 : index
      %160 = vector.load %arg3[%c22, %c0_67, %c0_68] : memref<49x1x128xf32, #tpu.memory_space<vmem>>, vector<1x1x128xf32>
      %161 = vector.shape_cast %160 : vector<1x1x128xf32> to vector<1x128xf32>
      %162 = vector.broadcast %161 : vector<1x128xf32> to vector<16x128xf32>
      %163 = arith.mulf %159, %162 : vector<16x128xf32>
      %164 = arith.addf %158, %163 : vector<16x128xf32>
      %165 = vector.extract_strided_slice %152 {offsets = [2, 0], sizes = [16, 128], strides = [1, 1]} : vector<22x128xf32> to vector<16x128xf32>
      %c23 = arith.constant 23 : index
      %c0_69 = arith.constant 0 : index
      %c0_70 = arith.constant 0 : index
      %166 = vector.load %arg3[%c23, %c0_69, %c0_70] : memref<49x1x128xf32, #tpu.memory_space<vmem>>, vector<1x1x128xf32>
      %167 = vector.shape_cast %166 : vector<1x1x128xf32> to vector<1x128xf32>
      %168 = vector.broadcast %167 : vector<1x128xf32> to vector<16x128xf32>
      %169 = arith.mulf %165, %168 : vector<16x128xf32>
      %170 = arith.addf %164, %169 : vector<16x128xf32>
      %171 = vector.extract_strided_slice %152 {offsets = [3, 0], sizes = [16, 128], strides = [1, 1]} : vector<22x128xf32> to vector<16x128xf32>
      %c24 = arith.constant 24 : index
      %c0_71 = arith.constant 0 : index
      %c0_72 = arith.constant 0 : index
      %172 = vector.load %arg3[%c24, %c0_71, %c0_72] : memref<49x1x128xf32, #tpu.memory_space<vmem>>, vector<1x1x128xf32>
      %173 = vector.shape_cast %172 : vector<1x1x128xf32> to vector<1x128xf32>
      %174 = vector.broadcast %173 : vector<1x128xf32> to vector<16x128xf32>
      %175 = arith.mulf %171, %174 : vector<16x128xf32>
      %176 = arith.addf %170, %175 : vector<16x128xf32>
      %177 = vector.extract_strided_slice %152 {offsets = [4, 0], sizes = [16, 128], strides = [1, 1]} : vector<22x128xf32> to vector<16x128xf32>
      %c25 = arith.constant 25 : index
      %c0_73 = arith.constant 0 : index
      %c0_74 = arith.constant 0 : index
      %178 = vector.load %arg3[%c25, %c0_73, %c0_74] : memref<49x1x128xf32, #tpu.memory_space<vmem>>, vector<1x1x128xf32>
      %179 = vector.shape_cast %178 : vector<1x1x128xf32> to vector<1x128xf32>
      %180 = vector.broadcast %179 : vector<1x128xf32> to vector<16x128xf32>
      %181 = arith.mulf %177, %180 : vector<16x128xf32>
      %182 = arith.addf %176, %181 : vector<16x128xf32>
      %183 = vector.extract_strided_slice %152 {offsets = [5, 0], sizes = [16, 128], strides = [1, 1]} : vector<22x128xf32> to vector<16x128xf32>
      %c26 = arith.constant 26 : index
      %c0_75 = arith.constant 0 : index
      %c0_76 = arith.constant 0 : index
      %184 = vector.load %arg3[%c26, %c0_75, %c0_76] : memref<49x1x128xf32, #tpu.memory_space<vmem>>, vector<1x1x128xf32>
      %185 = vector.shape_cast %184 : vector<1x1x128xf32> to vector<1x128xf32>
      %186 = vector.broadcast %185 : vector<1x128xf32> to vector<16x128xf32>
      %187 = arith.mulf %183, %186 : vector<16x128xf32>
      %188 = arith.addf %182, %187 : vector<16x128xf32>
      %189 = vector.extract_strided_slice %152 {offsets = [6, 0], sizes = [16, 128], strides = [1, 1]} : vector<22x128xf32> to vector<16x128xf32>
      %c27 = arith.constant 27 : index
      %c0_77 = arith.constant 0 : index
      %c0_78 = arith.constant 0 : index
      %190 = vector.load %arg3[%c27, %c0_77, %c0_78] : memref<49x1x128xf32, #tpu.memory_space<vmem>>, vector<1x1x128xf32>
      %191 = vector.shape_cast %190 : vector<1x1x128xf32> to vector<1x128xf32>
      %192 = vector.broadcast %191 : vector<1x128xf32> to vector<16x128xf32>
      %193 = arith.mulf %189, %192 : vector<16x128xf32>
      %194 = arith.addf %188, %193 : vector<16x128xf32>
      %c4_i32 = arith.constant 4 : i32
      %195 = arith.addi %arg6, %c4_i32 : i32
      %c0_79 = arith.constant 0 : index
      %196 = arith.index_cast %195 : i32 to index
      %c0_80 = arith.constant 0 : index
      %c0_81 = arith.constant 0 : index
      %197 = vector.load %arg2[%c0_79, %196, %c0_80, %c0_81] : memref<1x22x22x128xf32, #tpu.memory_space<vmem>>, vector<1x1x22x128xf32>
      %198 = vector.shape_cast %197 : vector<1x1x22x128xf32> to vector<22x128xf32>
      %199 = vector.extract_strided_slice %198 {offsets = [0, 0], sizes = [16, 128], strides = [1, 1]} : vector<22x128xf32> to vector<16x128xf32>
      %c28 = arith.constant 28 : index
      %c0_82 = arith.constant 0 : index
      %c0_83 = arith.constant 0 : index
      %200 = vector.load %arg3[%c28, %c0_82, %c0_83] : memref<49x1x128xf32, #tpu.memory_space<vmem>>, vector<1x1x128xf32>
      %201 = vector.shape_cast %200 : vector<1x1x128xf32> to vector<1x128xf32>
      %202 = vector.broadcast %201 : vector<1x128xf32> to vector<16x128xf32>
      %203 = arith.mulf %199, %202 : vector<16x128xf32>
      %204 = arith.addf %194, %203 : vector<16x128xf32>
      %205 = vector.extract_strided_slice %198 {offsets = [1, 0], sizes = [16, 128], strides = [1, 1]} : vector<22x128xf32> to vector<16x128xf32>
      %c29 = arith.constant 29 : index
      %c0_84 = arith.constant 0 : index
      %c0_85 = arith.constant 0 : index
      %206 = vector.load %arg3[%c29, %c0_84, %c0_85] : memref<49x1x128xf32, #tpu.memory_space<vmem>>, vector<1x1x128xf32>
      %207 = vector.shape_cast %206 : vector<1x1x128xf32> to vector<1x128xf32>
      %208 = vector.broadcast %207 : vector<1x128xf32> to vector<16x128xf32>
      %209 = arith.mulf %205, %208 : vector<16x128xf32>
      %210 = arith.addf %204, %209 : vector<16x128xf32>
      %211 = vector.extract_strided_slice %198 {offsets = [2, 0], sizes = [16, 128], strides = [1, 1]} : vector<22x128xf32> to vector<16x128xf32>
      %c30 = arith.constant 30 : index
      %c0_86 = arith.constant 0 : index
      %c0_87 = arith.constant 0 : index
      %212 = vector.load %arg3[%c30, %c0_86, %c0_87] : memref<49x1x128xf32, #tpu.memory_space<vmem>>, vector<1x1x128xf32>
      %213 = vector.shape_cast %212 : vector<1x1x128xf32> to vector<1x128xf32>
      %214 = vector.broadcast %213 : vector<1x128xf32> to vector<16x128xf32>
      %215 = arith.mulf %211, %214 : vector<16x128xf32>
      %216 = arith.addf %210, %215 : vector<16x128xf32>
      %217 = vector.extract_strided_slice %198 {offsets = [3, 0], sizes = [16, 128], strides = [1, 1]} : vector<22x128xf32> to vector<16x128xf32>
      %c31 = arith.constant 31 : index
      %c0_88 = arith.constant 0 : index
      %c0_89 = arith.constant 0 : index
      %218 = vector.load %arg3[%c31, %c0_88, %c0_89] : memref<49x1x128xf32, #tpu.memory_space<vmem>>, vector<1x1x128xf32>
      %219 = vector.shape_cast %218 : vector<1x1x128xf32> to vector<1x128xf32>
      %220 = vector.broadcast %219 : vector<1x128xf32> to vector<16x128xf32>
      %221 = arith.mulf %217, %220 : vector<16x128xf32>
      %222 = arith.addf %216, %221 : vector<16x128xf32>
      %223 = vector.extract_strided_slice %198 {offsets = [4, 0], sizes = [16, 128], strides = [1, 1]} : vector<22x128xf32> to vector<16x128xf32>
      %c32 = arith.constant 32 : index
      %c0_90 = arith.constant 0 : index
      %c0_91 = arith.constant 0 : index
      %224 = vector.load %arg3[%c32, %c0_90, %c0_91] : memref<49x1x128xf32, #tpu.memory_space<vmem>>, vector<1x1x128xf32>
      %225 = vector.shape_cast %224 : vector<1x1x128xf32> to vector<1x128xf32>
      %226 = vector.broadcast %225 : vector<1x128xf32> to vector<16x128xf32>
      %227 = arith.mulf %223, %226 : vector<16x128xf32>
      %228 = arith.addf %222, %227 : vector<16x128xf32>
      %229 = vector.extract_strided_slice %198 {offsets = [5, 0], sizes = [16, 128], strides = [1, 1]} : vector<22x128xf32> to vector<16x128xf32>
      %c33 = arith.constant 33 : index
      %c0_92 = arith.constant 0 : index
      %c0_93 = arith.constant 0 : index
      %230 = vector.load %arg3[%c33, %c0_92, %c0_93] : memref<49x1x128xf32, #tpu.memory_space<vmem>>, vector<1x1x128xf32>
      %231 = vector.shape_cast %230 : vector<1x1x128xf32> to vector<1x128xf32>
      %232 = vector.broadcast %231 : vector<1x128xf32> to vector<16x128xf32>
      %233 = arith.mulf %229, %232 : vector<16x128xf32>
      %234 = arith.addf %228, %233 : vector<16x128xf32>
      %235 = vector.extract_strided_slice %198 {offsets = [6, 0], sizes = [16, 128], strides = [1, 1]} : vector<22x128xf32> to vector<16x128xf32>
      %c34 = arith.constant 34 : index
      %c0_94 = arith.constant 0 : index
      %c0_95 = arith.constant 0 : index
      %236 = vector.load %arg3[%c34, %c0_94, %c0_95] : memref<49x1x128xf32, #tpu.memory_space<vmem>>, vector<1x1x128xf32>
      %237 = vector.shape_cast %236 : vector<1x1x128xf32> to vector<1x128xf32>
      %238 = vector.broadcast %237 : vector<1x128xf32> to vector<16x128xf32>
      %239 = arith.mulf %235, %238 : vector<16x128xf32>
      %240 = arith.addf %234, %239 : vector<16x128xf32>
      %c5_i32 = arith.constant 5 : i32
      %241 = arith.addi %arg6, %c5_i32 : i32
      %c0_96 = arith.constant 0 : index
      %242 = arith.index_cast %241 : i32 to index
      %c0_97 = arith.constant 0 : index
      %c0_98 = arith.constant 0 : index
      %243 = vector.load %arg2[%c0_96, %242, %c0_97, %c0_98] : memref<1x22x22x128xf32, #tpu.memory_space<vmem>>, vector<1x1x22x128xf32>
      %244 = vector.shape_cast %243 : vector<1x1x22x128xf32> to vector<22x128xf32>
      %245 = vector.extract_strided_slice %244 {offsets = [0, 0], sizes = [16, 128], strides = [1, 1]} : vector<22x128xf32> to vector<16x128xf32>
      %c35 = arith.constant 35 : index
      %c0_99 = arith.constant 0 : index
      %c0_100 = arith.constant 0 : index
      %246 = vector.load %arg3[%c35, %c0_99, %c0_100] : memref<49x1x128xf32, #tpu.memory_space<vmem>>, vector<1x1x128xf32>
      %247 = vector.shape_cast %246 : vector<1x1x128xf32> to vector<1x128xf32>
      %248 = vector.broadcast %247 : vector<1x128xf32> to vector<16x128xf32>
      %249 = arith.mulf %245, %248 : vector<16x128xf32>
      %250 = arith.addf %240, %249 : vector<16x128xf32>
      %251 = vector.extract_strided_slice %244 {offsets = [1, 0], sizes = [16, 128], strides = [1, 1]} : vector<22x128xf32> to vector<16x128xf32>
      %c36 = arith.constant 36 : index
      %c0_101 = arith.constant 0 : index
      %c0_102 = arith.constant 0 : index
      %252 = vector.load %arg3[%c36, %c0_101, %c0_102] : memref<49x1x128xf32, #tpu.memory_space<vmem>>, vector<1x1x128xf32>
      %253 = vector.shape_cast %252 : vector<1x1x128xf32> to vector<1x128xf32>
      %254 = vector.broadcast %253 : vector<1x128xf32> to vector<16x128xf32>
      %255 = arith.mulf %251, %254 : vector<16x128xf32>
      %256 = arith.addf %250, %255 : vector<16x128xf32>
      %257 = vector.extract_strided_slice %244 {offsets = [2, 0], sizes = [16, 128], strides = [1, 1]} : vector<22x128xf32> to vector<16x128xf32>
      %c37 = arith.constant 37 : index
      %c0_103 = arith.constant 0 : index
      %c0_104 = arith.constant 0 : index
      %258 = vector.load %arg3[%c37, %c0_103, %c0_104] : memref<49x1x128xf32, #tpu.memory_space<vmem>>, vector<1x1x128xf32>
      %259 = vector.shape_cast %258 : vector<1x1x128xf32> to vector<1x128xf32>
      %260 = vector.broadcast %259 : vector<1x128xf32> to vector<16x128xf32>
      %261 = arith.mulf %257, %260 : vector<16x128xf32>
      %262 = arith.addf %256, %261 : vector<16x128xf32>
      %263 = vector.extract_strided_slice %244 {offsets = [3, 0], sizes = [16, 128], strides = [1, 1]} : vector<22x128xf32> to vector<16x128xf32>
      %c38 = arith.constant 38 : index
      %c0_105 = arith.constant 0 : index
      %c0_106 = arith.constant 0 : index
      %264 = vector.load %arg3[%c38, %c0_105, %c0_106] : memref<49x1x128xf32, #tpu.memory_space<vmem>>, vector<1x1x128xf32>
      %265 = vector.shape_cast %264 : vector<1x1x128xf32> to vector<1x128xf32>
      %266 = vector.broadcast %265 : vector<1x128xf32> to vector<16x128xf32>
      %267 = arith.mulf %263, %266 : vector<16x128xf32>
      %268 = arith.addf %262, %267 : vector<16x128xf32>
      %269 = vector.extract_strided_slice %244 {offsets = [4, 0], sizes = [16, 128], strides = [1, 1]} : vector<22x128xf32> to vector<16x128xf32>
      %c39 = arith.constant 39 : index
      %c0_107 = arith.constant 0 : index
      %c0_108 = arith.constant 0 : index
      %270 = vector.load %arg3[%c39, %c0_107, %c0_108] : memref<49x1x128xf32, #tpu.memory_space<vmem>>, vector<1x1x128xf32>
      %271 = vector.shape_cast %270 : vector<1x1x128xf32> to vector<1x128xf32>
      %272 = vector.broadcast %271 : vector<1x128xf32> to vector<16x128xf32>
      %273 = arith.mulf %269, %272 : vector<16x128xf32>
      %274 = arith.addf %268, %273 : vector<16x128xf32>
      %275 = vector.extract_strided_slice %244 {offsets = [5, 0], sizes = [16, 128], strides = [1, 1]} : vector<22x128xf32> to vector<16x128xf32>
      %c40 = arith.constant 40 : index
      %c0_109 = arith.constant 0 : index
      %c0_110 = arith.constant 0 : index
      %276 = vector.load %arg3[%c40, %c0_109, %c0_110] : memref<49x1x128xf32, #tpu.memory_space<vmem>>, vector<1x1x128xf32>
      %277 = vector.shape_cast %276 : vector<1x1x128xf32> to vector<1x128xf32>
      %278 = vector.broadcast %277 : vector<1x128xf32> to vector<16x128xf32>
      %279 = arith.mulf %275, %278 : vector<16x128xf32>
      %280 = arith.addf %274, %279 : vector<16x128xf32>
      %281 = vector.extract_strided_slice %244 {offsets = [6, 0], sizes = [16, 128], strides = [1, 1]} : vector<22x128xf32> to vector<16x128xf32>
      %c41 = arith.constant 41 : index
      %c0_111 = arith.constant 0 : index
      %c0_112 = arith.constant 0 : index
      %282 = vector.load %arg3[%c41, %c0_111, %c0_112] : memref<49x1x128xf32, #tpu.memory_space<vmem>>, vector<1x1x128xf32>
      %283 = vector.shape_cast %282 : vector<1x1x128xf32> to vector<1x128xf32>
      %284 = vector.broadcast %283 : vector<1x128xf32> to vector<16x128xf32>
      %285 = arith.mulf %281, %284 : vector<16x128xf32>
      %286 = arith.addf %280, %285 : vector<16x128xf32>
      %c6_i32 = arith.constant 6 : i32
      %287 = arith.addi %arg6, %c6_i32 : i32
      %c0_113 = arith.constant 0 : index
      %288 = arith.index_cast %287 : i32 to index
      %c0_114 = arith.constant 0 : index
      %c0_115 = arith.constant 0 : index
      %289 = vector.load %arg2[%c0_113, %288, %c0_114, %c0_115] : memref<1x22x22x128xf32, #tpu.memory_space<vmem>>, vector<1x1x22x128xf32>
      %290 = vector.shape_cast %289 : vector<1x1x22x128xf32> to vector<22x128xf32>
      %291 = vector.extract_strided_slice %290 {offsets = [0, 0], sizes = [16, 128], strides = [1, 1]} : vector<22x128xf32> to vector<16x128xf32>
      %c42 = arith.constant 42 : index
      %c0_116 = arith.constant 0 : index
      %c0_117 = arith.constant 0 : index
      %292 = vector.load %arg3[%c42, %c0_116, %c0_117] : memref<49x1x128xf32, #tpu.memory_space<vmem>>, vector<1x1x128xf32>
      %293 = vector.shape_cast %292 : vector<1x1x128xf32> to vector<1x128xf32>
      %294 = vector.broadcast %293 : vector<1x128xf32> to vector<16x128xf32>
      %295 = arith.mulf %291, %294 : vector<16x128xf32>
      %296 = arith.addf %286, %295 : vector<16x128xf32>
      %297 = vector.extract_strided_slice %290 {offsets = [1, 0], sizes = [16, 128], strides = [1, 1]} : vector<22x128xf32> to vector<16x128xf32>
      %c43 = arith.constant 43 : index
      %c0_118 = arith.constant 0 : index
      %c0_119 = arith.constant 0 : index
      %298 = vector.load %arg3[%c43, %c0_118, %c0_119] : memref<49x1x128xf32, #tpu.memory_space<vmem>>, vector<1x1x128xf32>
      %299 = vector.shape_cast %298 : vector<1x1x128xf32> to vector<1x128xf32>
      %300 = vector.broadcast %299 : vector<1x128xf32> to vector<16x128xf32>
      %301 = arith.mulf %297, %300 : vector<16x128xf32>
      %302 = arith.addf %296, %301 : vector<16x128xf32>
      %303 = vector.extract_strided_slice %290 {offsets = [2, 0], sizes = [16, 128], strides = [1, 1]} : vector<22x128xf32> to vector<16x128xf32>
      %c44 = arith.constant 44 : index
      %c0_120 = arith.constant 0 : index
      %c0_121 = arith.constant 0 : index
      %304 = vector.load %arg3[%c44, %c0_120, %c0_121] : memref<49x1x128xf32, #tpu.memory_space<vmem>>, vector<1x1x128xf32>
      %305 = vector.shape_cast %304 : vector<1x1x128xf32> to vector<1x128xf32>
      %306 = vector.broadcast %305 : vector<1x128xf32> to vector<16x128xf32>
      %307 = arith.mulf %303, %306 : vector<16x128xf32>
      %308 = arith.addf %302, %307 : vector<16x128xf32>
      %309 = vector.extract_strided_slice %290 {offsets = [3, 0], sizes = [16, 128], strides = [1, 1]} : vector<22x128xf32> to vector<16x128xf32>
      %c45 = arith.constant 45 : index
      %c0_122 = arith.constant 0 : index
      %c0_123 = arith.constant 0 : index
      %310 = vector.load %arg3[%c45, %c0_122, %c0_123] : memref<49x1x128xf32, #tpu.memory_space<vmem>>, vector<1x1x128xf32>
      %311 = vector.shape_cast %310 : vector<1x1x128xf32> to vector<1x128xf32>
      %312 = vector.broadcast %311 : vector<1x128xf32> to vector<16x128xf32>
      %313 = arith.mulf %309, %312 : vector<16x128xf32>
      %314 = arith.addf %308, %313 : vector<16x128xf32>
      %315 = vector.extract_strided_slice %290 {offsets = [4, 0], sizes = [16, 128], strides = [1, 1]} : vector<22x128xf32> to vector<16x128xf32>
      %c46 = arith.constant 46 : index
      %c0_124 = arith.constant 0 : index
      %c0_125 = arith.constant 0 : index
      %316 = vector.load %arg3[%c46, %c0_124, %c0_125] : memref<49x1x128xf32, #tpu.memory_space<vmem>>, vector<1x1x128xf32>
      %317 = vector.shape_cast %316 : vector<1x1x128xf32> to vector<1x128xf32>
      %318 = vector.broadcast %317 : vector<1x128xf32> to vector<16x128xf32>
      %319 = arith.mulf %315, %318 : vector<16x128xf32>
      %320 = arith.addf %314, %319 : vector<16x128xf32>
      %321 = vector.extract_strided_slice %290 {offsets = [5, 0], sizes = [16, 128], strides = [1, 1]} : vector<22x128xf32> to vector<16x128xf32>
      %c47 = arith.constant 47 : index
      %c0_126 = arith.constant 0 : index
      %c0_127 = arith.constant 0 : index
      %322 = vector.load %arg3[%c47, %c0_126, %c0_127] : memref<49x1x128xf32, #tpu.memory_space<vmem>>, vector<1x1x128xf32>
      %323 = vector.shape_cast %322 : vector<1x1x128xf32> to vector<1x128xf32>
      %324 = vector.broadcast %323 : vector<1x128xf32> to vector<16x128xf32>
      %325 = arith.mulf %321, %324 : vector<16x128xf32>
      %326 = arith.addf %320, %325 : vector<16x128xf32>
      %327 = vector.extract_strided_slice %290 {offsets = [6, 0], sizes = [16, 128], strides = [1, 1]} : vector<22x128xf32> to vector<16x128xf32>
      %c48 = arith.constant 48 : index
      %c0_128 = arith.constant 0 : index
      %c0_129 = arith.constant 0 : index
      %328 = vector.load %arg3[%c48, %c0_128, %c0_129] : memref<49x1x128xf32, #tpu.memory_space<vmem>>, vector<1x1x128xf32>
      %329 = vector.shape_cast %328 : vector<1x1x128xf32> to vector<1x128xf32>
      %330 = vector.broadcast %329 : vector<1x128xf32> to vector<16x128xf32>
      %331 = arith.mulf %327, %330 : vector<16x128xf32>
      %332 = arith.addf %326, %331 : vector<16x128xf32>
      %333 = arith.truncf %332 : vector<16x128xf32> to vector<16x128xbf16>
      %c0_130 = arith.constant 0 : index
      %334 = arith.index_cast %arg6 : i32 to index
      %c0_131 = arith.constant 0 : index
      %c0_132 = arith.constant 0 : index
      %335 = vector.load %arg4[%c0_130, %334, %c0_131, %c0_132] : memref<1x16x16x128xbf16, #tpu.memory_space<vmem>>, vector<1x1x16x128xbf16>
      %336 = vector.shape_cast %335 : vector<1x1x16x128xbf16> to vector<16x128xbf16>
      %337 = vector.shape_cast %333 : vector<16x128xbf16> to vector<1x1x16x128xbf16>
      tpu.vector_store %arg4[%c0_130, %334, %c0_131, %c0_132], %337 {strides = array<i32>} : memref<1x16x16x128xbf16, #tpu.memory_space<vmem>>, vector<1x1x16x128xbf16>,
      %cst_133 = arith.constant dense<0.000000e+00> : vector<128xf32>
      %338 = vector.multi_reduction <add>, %332, %cst_133 [0] : vector<16x128xf32> to vector<128xf32>
      %339 = vector.shape_cast %338 : vector<128xf32> to vector<1x128xf32>
      %340 = arith.addf %arg7, %339 : vector<1x128xf32>
      %341 = arith.mulf %332, %332 : vector<16x128xf32>
      %cst_134 = arith.constant dense<0.000000e+00> : vector<128xf32>
      %342 = vector.multi_reduction <add>, %341, %cst_134 [0] : vector<16x128xf32> to vector<128xf32>
      %343 = vector.shape_cast %342 : vector<128xf32> to vector<1x128xf32>
      %344 = arith.addf %arg8, %343 : vector<1x128xf32>
      scf.yield %340, %344 : vector<1x128xf32>, vector<1x128xf32>
    }
    %c16_i32_1 = arith.constant 16 : i32
    %c0 = arith.constant 0 : index
    %c0_2 = arith.constant 0 : index
    %c0_3 = arith.constant 0 : index
    %4 = vector.load %arg5[%c0, %c0_2, %c0_3] : memref<1x2x128xf32, #tpu.memory_space<vmem>>, vector<1x1x128xf32>
    %5 = vector.shape_cast %4 : vector<1x1x128xf32> to vector<1x128xf32>
    %6 = vector.shape_cast %3#0 : vector<1x128xf32> to vector<1x1x128xf32>
    tpu.vector_store %arg5[%c0, %c0_2, %c0_3], %6 {strides = array<i32>} : memref<1x2x128xf32, #tpu.memory_space<vmem>>, vector<1x1x128xf32>,
    %c0_4 = arith.constant 0 : index
    %c1 = arith.constant 1 : index
    %c0_5 = arith.constant 0 : index
    %7 = vector.load %arg5[%c0_4, %c1, %c0_5] : memref<1x2x128xf32, #tpu.memory_space<vmem>>, vector<1x1x128xf32>
    %8 = vector.shape_cast %7 : vector<1x1x128xf32> to vector<1x128xf32>
    %9 = vector.shape_cast %3#1 : vector<1x128xf32> to vector<1x1x128xf32>
    tpu.vector_store %arg5[%c0_4, %c1, %c0_5], %9 {strides = array<i32>} : memref<1x2x128xf32, #tpu.memory_space<vmem>>, vector<1x1x128xf32>,
    return
  }
  func.func @transform_0(%arg0: i32, %arg1: i32) -> (i32, i32, i32, i32) {
    %c0_i32 = arith.constant 0 : i32
    %c0_i32_0 = arith.constant 0 : i32
    %c0_i32_1 = arith.constant 0 : i32
    return %arg0, %c0_i32, %c0_i32_0, %arg1 : i32, i32, i32, i32
  }
  func.func @transform_1(%arg0: i32, %arg1: i32) -> (i32, i32, i32) {
    %c0_i32 = arith.constant 0 : i32
    %c0_i32_0 = arith.constant 0 : i32
    %c0_i32_1 = arith.constant 0 : i32
    return %c0_i32, %c0_i32_0, %arg1 : i32, i32, i32
  }
  func.func @transform_2(%arg0: i32, %arg1: i32) -> (i32, i32, i32, i32) {
    %c0_i32 = arith.constant 0 : i32
    %c0_i32_0 = arith.constant 0 : i32
    %c0_i32_1 = arith.constant 0 : i32
    return %arg0, %c0_i32, %c0_i32_0, %arg1 : i32, i32, i32, i32
  }
  func.func @transform_3(%arg0: i32, %arg1: i32) -> (i32, i32, i32) {
    %c0_i32 = arith.constant 0 : i32
    %c0_i32_0 = arith.constant 0 : i32
    return %arg0, %c0_i32, %arg1 : i32, i32, i32
  }
}

module attributes {stable_mosaic.version = 11 : i64} {
  func.func @pw_fused_proj_kernel(%arg0: i32, %arg1: memref<256x128xbf16, #tpu.memory_space<vmem>>, %arg2: memref<256x128xbf16, #tpu.memory_space<vmem>>, %arg3: memref<128x128xbf16, #tpu.memory_space<vmem>>, %arg4: memref<1x128xf32, #tpu.memory_space<vmem>>, %arg5: memref<128x128xbf16, #tpu.memory_space<vmem>>, %arg6: memref<1x128xf32, #tpu.memory_space<vmem>>, %arg7: memref<128x128xbf16, #tpu.memory_space<vmem>>, %arg8: memref<1x128xf32, #tpu.memory_space<vmem>>, %arg9: memref<256x128xf32, #tpu.memory_space<vmem>>) attributes {dimension_semantics = [#tpu.dimension_semantics<parallel>], iteration_bounds = array<i64: 2>, scalar_prefetch = 0 : i64, scratch_operands = 0 : i64, tpu.core_type = #tpu.core_type<tc>, window_params = [{transform_indices = @transform_0, window_bounds = array<i64: 256, 128>}, {transform_indices = @transform_1, window_bounds = array<i64: 256, 128>}, {pipeline_mode = #tpu.pipeline_mode<synchronous>, transform_indices = @transform_2, window_bounds = array<i64: 128, 128>}, {pipeline_mode = #tpu.pipeline_mode<synchronous>, transform_indices = @transform_3, window_bounds = array<i64: 1, 128>}, {pipeline_mode = #tpu.pipeline_mode<synchronous>, transform_indices = @transform_4, window_bounds = array<i64: 128, 128>}, {pipeline_mode = #tpu.pipeline_mode<synchronous>, transform_indices = @transform_5, window_bounds = array<i64: 1, 128>}, {pipeline_mode = #tpu.pipeline_mode<synchronous>, transform_indices = @transform_6, window_bounds = array<i64: 128, 128>}, {pipeline_mode = #tpu.pipeline_mode<synchronous>, transform_indices = @transform_7, window_bounds = array<i64: 1, 128>}, {transform_indices = @transform_8, window_bounds = array<i64: 256, 128>}]} {
    %c0 = arith.constant 0 : index
    %c0_0 = arith.constant 0 : index
    %0 = vector.load %arg1[%c0, %c0_0] : memref<256x128xbf16, #tpu.memory_space<vmem>>, vector<256x128xbf16>
    %c0_1 = arith.constant 0 : index
    %c0_2 = arith.constant 0 : index
    %1 = vector.load %arg3[%c0_1, %c0_2] : memref<128x128xbf16, #tpu.memory_space<vmem>>, vector<128x128xbf16>
    %cst = arith.constant dense<0.000000e+00> : vector<256x128xf32>
    %2 = tpu.matmul %0, %1, %cst {dimension_numbers = #tpu.dot_dimension_numbers<[1], [0], [0], [1], [0, 0, 1, 1], [], []>} : vector<256x128xbf16>, vector<128x128xbf16>, vector<256x128xf32> -> vector<256x128xf32>
    %c0_3 = arith.constant 0 : index
    %c0_4 = arith.constant 0 : index
    %3 = vector.load %arg4[%c0_3, %c0_4] : memref<1x128xf32, #tpu.memory_space<vmem>>, vector<1x128xf32>
    %4 = vector.broadcast %3 : vector<1x128xf32> to vector<256x128xf32>
    %5 = arith.addf %2, %4 : vector<256x128xf32>
    %cst_5 = arith.constant 0.000000e+00 : f32
    %6 = vector.broadcast %cst_5 : f32 to vector<256x128xf32>
    %7 = arith.maximumf %5, %6 : vector<256x128xf32>
    %8 = arith.truncf %7 : vector<256x128xf32> to vector<256x128xbf16>
    %c0_6 = arith.constant 0 : index
    %c0_7 = arith.constant 0 : index
    %9 = vector.load %arg5[%c0_6, %c0_7] : memref<128x128xbf16, #tpu.memory_space<vmem>>, vector<128x128xbf16>
    %cst_8 = arith.constant dense<0.000000e+00> : vector<256x128xf32>
    %10 = tpu.matmul %8, %9, %cst_8 {dimension_numbers = #tpu.dot_dimension_numbers<[1], [0], [0], [1], [0, 0, 1, 1], [], []>} : vector<256x128xbf16>, vector<128x128xbf16>, vector<256x128xf32> -> vector<256x128xf32>
    %c0_9 = arith.constant 0 : index
    %c0_10 = arith.constant 0 : index
    %11 = vector.load %arg6[%c0_9, %c0_10] : memref<1x128xf32, #tpu.memory_space<vmem>>, vector<1x128xf32>
    %12 = vector.broadcast %11 : vector<1x128xf32> to vector<256x128xf32>
    %13 = arith.addf %10, %12 : vector<256x128xf32>
    %c0_11 = arith.constant 0 : index
    %c0_12 = arith.constant 0 : index
    %14 = vector.load %arg2[%c0_11, %c0_12] : memref<256x128xbf16, #tpu.memory_space<vmem>>, vector<256x128xbf16>
    %c0_13 = arith.constant 0 : index
    %c0_14 = arith.constant 0 : index
    %15 = vector.load %arg7[%c0_13, %c0_14] : memref<128x128xbf16, #tpu.memory_space<vmem>>, vector<128x128xbf16>
    %cst_15 = arith.constant dense<0.000000e+00> : vector<256x128xf32>
    %16 = tpu.matmul %14, %15, %cst_15 {dimension_numbers = #tpu.dot_dimension_numbers<[1], [0], [0], [1], [0, 0, 1, 1], [], []>} : vector<256x128xbf16>, vector<128x128xbf16>, vector<256x128xf32> -> vector<256x128xf32>
    %c0_16 = arith.constant 0 : index
    %c0_17 = arith.constant 0 : index
    %17 = vector.load %arg8[%c0_16, %c0_17] : memref<1x128xf32, #tpu.memory_space<vmem>>, vector<1x128xf32>
    %18 = vector.broadcast %17 : vector<1x128xf32> to vector<256x128xf32>
    %19 = arith.addf %16, %18 : vector<256x128xf32>
    %20 = arith.addf %13, %19 : vector<256x128xf32>
    %c0_18 = arith.constant 0 : index
    %c0_19 = arith.constant 0 : index
    %21 = vector.load %arg9[%c0_18, %c0_19] : memref<256x128xf32, #tpu.memory_space<vmem>>, vector<256x128xf32>
    tpu.vector_store %arg9[%c0_18, %c0_19], %20 {strides = array<i32>} : memref<256x128xf32, #tpu.memory_space<vmem>>, vector<256x128xf32>,
    return
  }
  func.func @transform_0(%arg0: i32) -> (i32, i32) {
    %c0_i32 = arith.constant 0 : i32
    %c0_i32_0 = arith.constant 0 : i32
    return %arg0, %c0_i32 : i32, i32
  }
  func.func @transform_1(%arg0: i32) -> (i32, i32) {
    %c0_i32 = arith.constant 0 : i32
    %c0_i32_0 = arith.constant 0 : i32
    return %arg0, %c0_i32 : i32, i32
  }
  func.func @transform_2(%arg0: i32) -> (i32, i32) {
    %c0_i32 = arith.constant 0 : i32
    %c0_i32_0 = arith.constant 0 : i32
    %c0_i32_1 = arith.constant 0 : i32
    return %c0_i32, %c0_i32_0 : i32, i32
  }
  func.func @transform_3(%arg0: i32) -> (i32, i32) {
    %c0_i32 = arith.constant 0 : i32
    %c0_i32_0 = arith.constant 0 : i32
    %c0_i32_1 = arith.constant 0 : i32
    return %c0_i32, %c0_i32_0 : i32, i32
  }
  func.func @transform_4(%arg0: i32) -> (i32, i32) {
    %c0_i32 = arith.constant 0 : i32
    %c0_i32_0 = arith.constant 0 : i32
    %c0_i32_1 = arith.constant 0 : i32
    return %c0_i32, %c0_i32_0 : i32, i32
  }
  func.func @transform_5(%arg0: i32) -> (i32, i32) {
    %c0_i32 = arith.constant 0 : i32
    %c0_i32_0 = arith.constant 0 : i32
    %c0_i32_1 = arith.constant 0 : i32
    return %c0_i32, %c0_i32_0 : i32, i32
  }
  func.func @transform_6(%arg0: i32) -> (i32, i32) {
    %c0_i32 = arith.constant 0 : i32
    %c0_i32_0 = arith.constant 0 : i32
    %c0_i32_1 = arith.constant 0 : i32
    return %c0_i32, %c0_i32_0 : i32, i32
  }
  func.func @transform_7(%arg0: i32) -> (i32, i32) {
    %c0_i32 = arith.constant 0 : i32
    %c0_i32_0 = arith.constant 0 : i32
    %c0_i32_1 = arith.constant 0 : i32
    return %c0_i32, %c0_i32_0 : i32, i32
  }
  func.func @transform_8(%arg0: i32) -> (i32, i32) {
    %c0_i32 = arith.constant 0 : i32
    %c0_i32_0 = arith.constant 0 : i32
    return %arg0, %c0_i32 : i32, i32
  }
}

</mosaic_0001>

<bundles_post_ra>
// kernel: convnext_forward.4
= control target key start
LH: loop header
LB: loop body
LE: loop exit
PB: predicated region body
PF: predicated region fallthrough
CT: control target
= control target key end

     0   :  { %s836_s9 = smov 0   ;;  %s920_s0 = inlined_call_operand.vmem [shape: bf16[512,128], index: 0, kind: input, shape index: {}]   ;;  %s921_s1 = inlined_call_operand.vmem [shape: bf16[128,128], index: 1, kind: input, shape index: {}]   ;;  %s922_s2 = inlined_call_operand.vmem [shape: f32[2,2,128], index: 2, kind: output, shape index: {}]  }
   0x1 LB: > { %s842_s10 = sadd.s32 4294967295, %s819_s9   ;;  %p663_p0 = scmp.ge.s32.totalorder %s819_s9, 1  ;;  %s819_s9 = sphi %s836_s9, %s12_s9  }
   0x2   : > { %p113_p1 = scmp.lt.s32.totalorder %s819_s9, 3 }
   0x4   : > { %p114_p2 = pnand %p663_p0, %p113_p1 }
   0x5   : > { %s664_s13 = sshll.u32 (!%p114_p2), %s842_s10, 5  ;;  %p140_p4 = scmp.lt.s32.totalorder (!%p114_p2), %s842_s10, 1 }
   0x6   : > { %117 = sbr.rel (%p114_p2) target bundleno = 320 (0x140), region = 28  ;;  %p135_p3 = scmp.lt.s32.totalorder (!%p114_p2), %s664_s13, 63 }
   0xb   : > { %v789_v0 = vld [vmem:[%s921_s1 + $0x38] sm:$0xff]   ;;  %v790_v1 = vld [vmem:[%s921_s1 + $0x30] sm:$0xff]   ;;  %s924_s13 = smov (!%p135_p3, %s664_s13), 63  ;;  %v791_v2 = vld [vmem:[%s921_s1 + $0x28] sm:$0xff]   ;;  %s926_s10 = smov (!%p140_p4, %s842_s10), 1 }
   0xc   : > { %717 = vmatprep.subr.bf16.mxu0 %v789_v0  ;;  %765 = vmatprep.subr.bf16.mxu1 %v789_v0  ;;  %s665_s18 = sshll.u32 %s924_s13, 2  ;;  %v792_v3 = vld [vmem:[%s921_s1 + $0x20] sm:$0xff]   ;;  %v793_v5 = vld [vmem:[%s921_s1 + $0x18] sm:$0xff]   ;;  %v794_v6 = vld [vmem:[%s921_s1 + $0x10] sm:$0xff]   ;;  %s666_s4 = sshll.u32 %s926_s10, 1 }
   0xd   : > { %718 = vmatpush3.bf16.msra.mxu0 %v789_v0  ;;  %773 = vmatpush3.bf16.msra.mxu1 %v789_v0  ;;  %s859_s21 = scalar_lea.vmem %s920_s0, %s665_s18  ;;  %v795_v8 = vld [vmem:[%s921_s1 + $0x8] sm:$0xff]   ;;  %v796_v9 = vld [vmem:[%s921_s1] sm:$0xff]   ;;  %s143_s7 = scalar_lea.vmem %s922_s2, %s666_s4 }
   0xe   : > { %719 = vmatprep.subr.bf16.mxu0 %v790_v1  ;;  %766 = vmatprep.subr.bf16.mxu1 %v790_v1  ;;  %v797_v4 = vld [vmem:[%s859_s21] sm:$0xff]   ;;  %v798_v10 = vld [vmem:[%s859_s21 + $0x8] sm:$0xff]   ;;  %v799_v12 = vld [vmem:[%s859_s21 + $0x10] sm:$0xff]  }
   0xf   : > { %733 = vmatprep.mubr.bf16.mxu0 %v797_v4  ;;  %v805_v7 = vld [vmem:[%s859_s21 + $0x40] sm:$0xff]   ;;  %v806_v11 = vld [vmem:[%s859_s21 + $0x48] sm:$0xff]   ;;  %v807_v13 = vld [vmem:[%s859_s21 + $0x50] sm:$0xff]  }
  0x10   : > { %749 = vmatprep.mubr.bf16.mxu1 %v805_v7  ;;  %v800_v14 = vld [vmem:[%s859_s21 + $0x18] sm:$0xff]   ;;  %v801_v16 = vld [vmem:[%s859_s21 + $0x20] sm:$0xff]   ;;  %v802_v18 = vld [vmem:[%s859_s21 + $0x28] sm:$0xff]  }
  0x11   : > { %720 = vmatpush3.bf16.msra.mxu0 %v790_v1  ;;  %774 = vmatpush3.bf16.msra.mxu1 %v790_v1  ;;  %v808_v15 = vld [vmem:[%s859_s21 + $0x58] sm:$0xff]   ;;  %v809_v17 = vld [vmem:[%s859_s21 + $0x60] sm:$0xff]   ;;  %v810_v19 = vld [vmem:[%s859_s21 + $0x68] sm:$0xff]  }
  0x12   : > { %721 = vmatprep.subr.bf16.mxu0 %v791_v2  ;;  %767 = vmatprep.subr.bf16.mxu1 %v791_v2  ;;  %v803_v20 = vld [vmem:[%s859_s21 + $0x30] sm:$0xff]   ;;  %v804_v22 = vld [vmem:[%s859_s21 + $0x38] sm:$0xff]  }
  0x13   : > { %v811_v21 = vld [vmem:[%s859_s21 + $0x70] sm:$0xff]   ;;  %v812_v23 = vld [vmem:[%s859_s21 + $0x78] sm:$0xff]  }
  0x15   : > { %722 = vmatpush3.bf16.msra.mxu0 %v791_v2  ;;  %775 = vmatpush3.bf16.msra.mxu1 %v791_v2 }
  0x16   : > { %723 = vmatprep.subr.bf16.mxu0 %v792_v3  ;;  %768 = vmatprep.subr.bf16.mxu1 %v792_v3 }
  0x19   : > { %724 = vmatpush3.bf16.msra.mxu0 %v792_v3  ;;  %776 = vmatpush3.bf16.msra.mxu1 %v792_v3 }
  0x1a   : > { %725 = vmatprep.subr.bf16.mxu0 %v793_v5  ;;  %769 = vmatprep.subr.bf16.mxu1 %v793_v5 }
  0x1d   : > { %726 = vmatpush3.bf16.msra.mxu0 %v793_v5  ;;  %777 = vmatpush3.bf16.msra.mxu1 %v793_v5 }
  0x1e   : > { %727 = vmatprep.subr.bf16.mxu0 %v794_v6  ;;  %770 = vmatprep.subr.bf16.mxu1 %v794_v6 }
  0x21   : > { %728 = vmatpush3.bf16.msra.mxu0 %v794_v6  ;;  %778 = vmatpush3.bf16.msra.mxu1 %v794_v6 }
  0x22   : > { %729 = vmatprep.subr.bf16.mxu0 %v795_v8  ;;  %771 = vmatprep.subr.bf16.mxu1 %v795_v8 }
  0x25   : > { %730 = vmatpush3.bf16.msra.mxu0 %v795_v8  ;;  %779 = vmatpush3.bf16.msra.mxu1 %v795_v8 }
  0x26   : > { %731 = vmatprep.subr.bf16.mxu0 %v796_v9  ;;  %772 = vmatprep.subr.bf16.mxu1 %v796_v9 }
  0x29   : > { %732 = vmatpush3.bf16.msra.mxu0 %v796_v9  ;;  %780 = vmatpush3.bf16.msra.mxu1 %v796_v9 }
  0x2c   : > { %734 = vmatmul.mubr.bf16.vlgmr.msra.gmra.mxu0 %v798_v10  ;;  %750 = vmatmul.mubr.bf16.vlgmr.msra.gmra.mxu1 %v806_v11 }
  0x2d   : > { %737 = vmatprep.mubr.bf16.mxu0 %v799_v12  ;;  %753 = vmatprep.mubr.bf16.mxu1 %v807_v13 }
  0x34   : > { %738 = vmatmul.mubr.bf16.gmra.mxu0 %v800_v14  ;;  %754 = vmatmul.mubr.bf16.gmra.mxu1 %v808_v15 }
  0x35   : > { %741 = vmatprep.mubr.bf16.mxu0 %v801_v16  ;;  %757 = vmatprep.mubr.bf16.mxu1 %v809_v17 }
  0x3c   : > { %742 = vmatmul.mubr.bf16.gmra.mxu0 %v802_v18  ;;  %758 = vmatmul.mubr.bf16.gmra.mxu1 %v810_v19 }
  0x3d   : > { %745 = vmatprep.mubr.bf16.mxu0 %v803_v20  ;;  %761 = vmatprep.mubr.bf16.mxu1 %v811_v21 }
  0x44   : > { %746 = vmatmul.mubr.bf16.gmra.mxu0 %v804_v22  ;;  %762 = vmatmul.mubr.bf16.gmra.mxu1 %v812_v23 }
  0xec   : > { %v735_v24 = vpop.f32.mrf.mxu0  ;;  %v892_v25 = vpop.f32.mrf.mxu1 }
  0xed   : > { %v538_v35 = vmul.f32 %v735_v24, %v735_v24 }
  0xee   : > { %v371_v26 = vpop.f32.mrf.mxu0  ;;  %v894_v28 = vpop.f32.mrf.mxu1 }
  0xef   : > { %v536_v30 = vmul.f32 %v371_v26, %v371_v26 }
  0xf0   : > { %v736_v27 = vpop.f32.mrf.mxu0  ;;  %v896_v34 = vpop.f32.mrf.mxu1 }
  0xf1   : > { %v539_v39 = vmul.f32 %v736_v27, %v736_v27 }
  0xf2   : > { %v374_v29 = vpop.f32.mrf.mxu0  ;;  %v438_v43 = vpop.f32.mrf.mxu1 }
  0xf3   : > { %v498_v31 = vadd.f32 %v374_v29, %v371_v26  ;;  %v537_v32 = vmul.f32 %v374_v29, %v374_v29 }
  0xf4   : > { %v739_v33 = vpop.f32.mrf.mxu0  ;;  %v898_v52 = vpop.f32.mrf.mxu1 }
  0xf5   : > { %v499_v36 = vadd.f32 %v735_v24, %v498_v31  ;;  %v568_v37 = vadd.f32 %v537_v32, %v536_v30  ;;  %v542_v53 = vmul.f32 %v739_v33, %v739_v33 }
  0xf6   : > { %v387_v38 = vpop.f32.mrf.mxu0  ;;  %v451_v61 = vpop.f32.mrf.mxu1 }
  0xf7   : > { %v569_v40 = vadd.f32 %v568_v37, %v538_v35  ;;  %v500_v41 = vadd.f32 %v736_v27, %v499_v36  ;;  %v540_v45 = vmul.f32 %v387_v38, %v387_v38 }
  0xf8   : > { %v740_v42 = vpop.f32.mrf.mxu0  ;;  %v756_v6 = vpop.f32.mrf.mxu1 }
  0xf9   : > { %v501_v44 = vadd.f32 %v500_v41, %v387_v38  ;;  %v570_v46 = vadd.f32 %v569_v40, %v539_v39  ;;  %v543_v57 = vmul.f32 %v740_v42, %v740_v42  ;;  %v553_v38 = vmul.f32 %v438_v43, %v438_v43 }
  0xfa   : > { %v390_v47 = vpop.f32.mrf.mxu0  ;;  %v454_v15 = vpop.f32.mrf.mxu1  ;;  %v554_v41 = vmul.f32 %v892_v25, %v892_v25 }
  0xfb   : > { %v571_v48 = vadd.f32 %v570_v46, %v540_v45  ;;  %v502_v49 = vadd.f32 %v501_v44, %v390_v47  ;;  %v541_v50 = vmul.f32 %v390_v47, %v390_v47  ;;  %v555_v45 = vmul.f32 %v896_v34, %v896_v34 }
  0xfc   : > { %v743_v51 = vpop.f32.mrf.mxu0  ;;  %v759_v23 = vpop.f32.mrf.mxu1 }
  0xfd   : > { %v503_v54 = vadd.f32 %v739_v33, %v502_v49  ;;  %v572_v55 = vadd.f32 %v571_v48, %v541_v50  ;;  %v546_v7 = vmul.f32 %v743_v51, %v743_v51  ;;  %v552_v33 = vmul.f32 %v894_v28, %v894_v28 }
  0xfe   : > { %v403_v56 = vpop.f32.mrf.mxu0  ;;  %v467_v32 = vpop.f32.mrf.mxu1  ;;  %v556_v50 = vmul.f32 %v451_v61, %v451_v61 }
  0xff   : > { %v573_v58 = vadd.f32 %v572_v55, %v542_v53  ;;  %v504_v59 = vadd.f32 %v740_v42, %v503_v54  ;;  %v544_v63 = vmul.f32 %v403_v56, %v403_v56  ;;  %v557_v53 = vmul.f32 %v454_v15, %v454_v15 }
 0x100   : > { %v744_v60 = vpop.f32.mrf.mxu0  ;;  %v760_v40 = vpop.f32.mrf.mxu1  ;;  %v558_v55 = vmul.f32 %v898_v52, %v898_v52 }
 0x101   : > { %v505_v62 = vadd.f32 %v504_v59, %v403_v56  ;;  %v574_v0 = vadd.f32 %v573_v58, %v543_v57  ;;  %v547_v11 = vmul.f32 %v744_v60, %v744_v60  ;;  %v559_v57 = vmul.f32 %v756_v6, %v756_v6 }
 0x102   : > { %v406_v1 = vpop.f32.mrf.mxu0  ;;  %v470_v48 = vpop.f32.mrf.mxu1 }
 0x103   : > { %v575_v2 = vadd.f32 %v574_v0, %v544_v63  ;;  %v506_v3 = vadd.f32 %v505_v62, %v406_v1  ;;  %v545_v4 = vmul.f32 %v406_v1, %v406_v1  ;;  %v561_v1 = vmul.f32 %v470_v48, %v470_v48 }
 0x104   : > { %v747_v5 = vpop.f32.mrf.mxu0  ;;  %v763_v54 = vpop.f32.mrf.mxu1 }
 0x105   : > { %v507_v8 = vadd.f32 %v743_v51, %v506_v3  ;;  %v576_v9 = vadd.f32 %v575_v2, %v545_v4  ;;  %v550_v24 = vmul.f32 %v747_v5, %v747_v5  ;;  %v562_v3 = vmul.f32 %v759_v23, %v759_v23 }
 0x106   : > { %v419_v10 = vpop.f32.mrf.mxu0 }
 0x107   : > { %v577_v12 = vadd.f32 %v576_v9, %v546_v7  ;;  %v508_v13 = vadd.f32 %v744_v60, %v507_v8  ;;  %v548_v17 = vmul.f32 %v419_v10, %v419_v10  ;;  %v483_v60 = vpop.f32.mrf.mxu1  ;;  %v563_v7 = vmul.f32 %v760_v40, %v760_v40 }
 0x108   : > { %v748_v14 = vpop.f32.mrf.mxu0 }
 0x109   : > { %v509_v16 = vadd.f32 %v508_v13, %v419_v10  ;;  %v578_v18 = vadd.f32 %v577_v12, %v547_v11  ;;  %v551_v29 = vmul.f32 %v748_v14, %v748_v14  ;;  %v764_v2 = vpop.f32.mrf.mxu1  ;;  %v564_v11 = vmul.f32 %v483_v60, %v483_v60 }
 0x10a   : > { %v422_v19 = vpop.f32.mrf.mxu0 }
 0x10b   : > { %v579_v20 = vadd.f32 %v578_v18, %v548_v17  ;;  %v510_v21 = vadd.f32 %v509_v16, %v422_v19  ;;  %v549_v22 = vmul.f32 %v422_v19, %v422_v19  ;;  %v567_v18 = vmul.f32 %v764_v2, %v764_v2 }
 0x10d   : > { %v511_v26 = vadd.f32 %v747_v5, %v510_v21  ;;  %v580_v27 = vadd.f32 %v579_v20, %v549_v22 }
 0x10f   : > { %v512_v30 = vadd.f32 %v748_v14, %v511_v26  ;;  %v581_v31 = vadd.f32 %v580_v27, %v550_v24 }
 0x111   : > { %v582_v35 = vadd.f32 %v581_v31, %v551_v29  ;;  %v513_v36 = vadd.f32 %v512_v30, %v894_v28 }
 0x113   : > { %v514_v37 = vadd.f32 %v513_v36, %v438_v43  ;;  %v583_v39 = vadd.f32 %v582_v35, %v552_v33 }
 0x115   : > { %v515_v42 = vadd.f32 %v892_v25, %v514_v37  ;;  %v584_v44 = vadd.f32 %v583_v39, %v553_v38 }
 0x117   : > { %v585_v46 = vadd.f32 %v584_v44, %v554_v41  ;;  %v516_v47 = vadd.f32 %v896_v34, %v515_v42  ;;  %v560_v34 = vmul.f32 %v467_v32, %v467_v32 }
 0x119   : > { %v517_v49 = vadd.f32 %v516_v47, %v451_v61  ;;  %v586_v28 = vadd.f32 %v585_v46, %v555_v45 }
 0x11b   : > { %v587_v51 = vadd.f32 %v586_v28, %v556_v50  ;;  %v518_v43 = vadd.f32 %v517_v49, %v454_v15  ;;  %v566_v15 = vmul.f32 %v763_v54, %v763_v54 }
 0x11d   : > { %v519_v25 = vadd.f32 %v898_v52, %v518_v43  ;;  %v588_v56 = vadd.f32 %v587_v51, %v557_v53  ;;  %v486_v52 = vpop.f32.mrf.mxu1 }
 0x11e   : > { %v565_v14 = vmul.f32 %v486_v52, %v486_v52 }
 0x11f   : > { %v589_v58 = vadd.f32 %v588_v56, %v558_v55  ;;  %v520_v59 = vadd.f32 %v756_v6, %v519_v25 }
 0x121   : > { %v521_v62 = vadd.f32 %v520_v59, %v467_v32  ;;  %v590_v63 = vadd.f32 %v589_v58, %v559_v57 }
 0x123   : > { %v591_v0 = vadd.f32 %v590_v63, %v560_v34  ;;  %v522_v61 = vadd.f32 %v521_v62, %v470_v48 }
 0x125   : > { %v523_v4 = vadd.f32 %v759_v23, %v522_v61  ;;  %v592_v5 = vadd.f32 %v591_v0, %v561_v1 }
 0x127   : > { %v593_v8 = vadd.f32 %v592_v5, %v562_v3  ;;  %v524_v9 = vadd.f32 %v760_v40, %v523_v4 }
 0x129   : > { %v525_v10 = vadd.f32 %v524_v9, %v483_v60  ;;  %v594_v6 = vadd.f32 %v593_v8, %v563_v7 }
 0x12b   : > { %v595_v12 = vadd.f32 %v594_v6, %v564_v11  ;;  %v526_v13 = vadd.f32 %v525_v10, %v486_v52 }
 0x12d   : > { %v527_v16 = vadd.f32 %v763_v54, %v526_v13  ;;  %v596_v17 = vadd.f32 %v595_v12, %v565_v14 }
 0x12f   : > { %v528_v19 = vadd.f32 %v764_v2, %v527_v16  ;;  %v597_v20 = vadd.f32 %v596_v17, %v566_v15 }
 0x131   : > { %v529_v21 = vrot.slane %v528_v19, 4  ;;  %v598_v22 = vadd.f32 %v597_v20, %v567_v18 }
 0x133   : > { %v530_v23 = vadd.f32 %v529_v21, %v528_v19  ;;  %v599_v24 = vrot.slane %v598_v22, 4 }
 0x135   : > { %v531_v26 = vrot.slane %v530_v23, 2  ;;  %v600_v27 = vadd.f32 %v599_v24, %v598_v22 }
 0x137   : > { %v532_v29 = vadd.f32 %v531_v26, %v530_v23  ;;  %v601_v30 = vrot.slane %v600_v27, 2 }
 0x139   : > { %v533_v31 = vrot.slane %v532_v29, 1  ;;  %v602_v32 = vadd.f32 %v601_v30, %v600_v27 }
 0x13b   : > { %v534_v33 = vadd.f32 %v533_v31, %v532_v29  ;;  %v603_v35 = vrot.slane %v602_v32, 1 }
 0x13d   : > { %535 = vst [vmem:[%s143_s7] sm:$0x1] %v534_v33  ;;  %v604_v36 = vadd.f32 %v603_v35, %v602_v32 }
 0x13f   : > { %605 = vst [vmem:[%s143_s7 + $0x1] sm:$0x1] %v604_v36 }
 0x140 PF: > { %s12_s9 = sadd.s32 1, %s819_s9  }
 0x141   : > { %p9_p5 = scmp.ge.s32.totalorder %s12_s9, 4  }
 0x143   :  { %11 = sbr.rel (!%p9_p5) target bundleno = 1 (0x1), region = 58 }

// kernel: convnext_forward.5
= control target key start
LH: loop header
LB: loop body
LE: loop exit
PB: predicated region body
PF: predicated region fallthrough
CT: control target
= control target key end

     0   :  { %s1885_s27 = smov 0   ;;  %s2211_s0 = inlined_call_operand.vmem [shape: bf16[512,128], index: 0, kind: input, shape index: {}]   ;;  %s2212_s1 = inlined_call_operand.vmem [shape: bf16[512,128], index: 1, kind: input, shape index: {}]   ;;  %s2213_s2 = inlined_call_operand.vmem [shape: bf16[128,128], index: 2, kind: input, shape index: {}]   ;;  %s2214_s3 = inlined_call_operand.vmem [shape: f32[1,128], index: 3, kind: input, shape index: {}]   ;;  %s2215_s4 = inlined_call_operand.vmem [shape: bf16[128,128], index: 4, kind: input, shape index: {}]   ;;  %s2216_s5 = inlined_call_operand.vmem [shape: f32[1,128], index: 5, kind: input, shape index: {}]   ;;  %s2217_s6 = inlined_call_operand.vmem [shape: bf16[128,128], index: 6, kind: input, shape index: {}]   ;;  %s2218_s7 = inlined_call_operand.vmem [shape: f32[1,128], index: 7, kind: input, shape index: {}]   ;;  %s2219_s8 = inlined_call_operand.vmem [shape: f32[512,128], index: 8, kind: output, shape index: {}]  }
   0x1 LB: > { %s1464_s28 = sadd.s32 4294967295, %s1838_s27   ;;  %p1468_p0 = scmp.ge.s32.totalorder %s1838_s27, 1  ;;  %s1838_s27 = sphi %s1885_s27, %s18_s27  }
   0x2   : > { %p274_p1 = scmp.lt.s32.totalorder %s1838_s27, 3 }
   0x4   : > { %p275_p2 = pnand %p1468_p0, %p274_p1 }
   0x5   : > { %s1469_s9 = sshll.u32 (!%p275_p2), %s1464_s28, 5 }
   0x6   : > { %278 = sbr.rel (%p275_p2) target bundleno = 510 (0x1fe), region = 52  ;;  %p314_p3 = scmp.lt.s32.totalorder (!%p275_p2), %s1469_s9, 63 }
   0xb   : > { %v1776_v0 = vld [vmem:[%s2213_s2 + $0x38] sm:$0xff]   ;;  %v1777_v1 = vld [vmem:[%s2213_s2 + $0x30] sm:$0xff]   ;;  %s2221_s9 = smov (!%p314_p3, %s1469_s9), 63  ;;  %v1778_v2 = vld [vmem:[%s2213_s2 + $0x28] sm:$0xff]  }
   0xc   : > { %1608 = vmatprep.subr.bf16.mxu0 %v1776_v0  ;;  %1752 = vmatprep.subr.bf16.mxu1 %v1776_v0  ;;  %s1470_s14 = sshll.u32 %s2221_s9, 2  ;;  %v1779_v3 = vld [vmem:[%s2213_s2 + $0x20] sm:$0xff]   ;;  %v1780_v5 = vld [vmem:[%s2213_s2 + $0x18] sm:$0xff]   ;;  %v1781_v6 = vld [vmem:[%s2213_s2 + $0x10] sm:$0xff]   ;;  %s1474_s10 = sshll.u32 %s2221_s9, 3 }
   0xd   : > { %1609 = vmatpush3.bf16.msra.mxu0 %v1776_v0  ;;  %1760 = vmatpush3.bf16.msra.mxu1 %v1776_v0  ;;  %s1910_s17 = scalar_lea.vmem %s2211_s0, %s1470_s14  ;;  %v1782_v8 = vld [vmem:[%s2213_s2 + $0x8] sm:$0xff]   ;;  %v1783_v9 = vld [vmem:[%s2213_s2] sm:$0xff]   ;;  %v1800_v10 = vld [vmem:[%s2217_s6 + $0x38] sm:$0xff]   ;;  %s1956_s24 = scalar_lea.vmem %s2212_s1, %s1470_s14 }
   0xe   : > { %1610 = vmatprep.subr.bf16.mxu0 %v1777_v1  ;;  %1753 = vmatprep.subr.bf16.mxu1 %v1777_v1  ;;  %v1784_v4 = vld [vmem:[%s1910_s17] sm:$0xff]   ;;  %v1785_v11 = vld [vmem:[%s1910_s17 + $0x8] sm:$0xff]   ;;  %v1802_v12 = vld [vmem:[%s2215_s4 + $0x38] sm:$0xff]   ;;  %s2096_s13 = scalar_lea.vmem %s2219_s8, %s1474_s10 }
   0xf   : > { %1624 = vmatprep.mubr.bf16.mxu0 %v1784_v4  ;;  %v1792_v7 = vld [vmem:[%s1910_s17 + $0x40] sm:$0xff]   ;;  %v1786_v13 = vld [vmem:[%s1910_s17 + $0x10] sm:$0xff]   ;;  %v1793_v14 = vld [vmem:[%s1910_s17 + $0x48] sm:$0xff]  }
  0x10   : > { %1640 = vmatprep.mubr.bf16.mxu1 %v1792_v7  ;;  %v1794_v15 = vld [vmem:[%s1910_s17 + $0x50] sm:$0xff]   ;;  %v1803_v18 = vld [vmem:[%s2217_s6 + $0x28] sm:$0xff]   ;;  %v1787_v20 = vld [vmem:[%s1910_s17 + $0x18] sm:$0xff]  }
  0x11   : > { %1611 = vmatpush3.bf16.msra.mxu0 %v1777_v1  ;;  %1761 = vmatpush3.bf16.msra.mxu1 %v1777_v1  ;;  %v1801_v16 = vld [vmem:[%s2217_s6 + $0x30] sm:$0xff]   ;;  %v1806_v19 = vld [vmem:[%s2215_s4 + $0x28] sm:$0xff]   ;;  %v1795_v21 = vld [vmem:[%s1910_s17 + $0x58] sm:$0xff]  }
  0x12   : > { %1612 = vmatprep.subr.bf16.mxu0 %v1778_v2  ;;  %1754 = vmatprep.subr.bf16.mxu1 %v1778_v2  ;;  %v1804_v17 = vld [vmem:[%s2215_s4 + $0x30] sm:$0xff]   ;;  %v1788_v22 = vld [vmem:[%s1910_s17 + $0x20] sm:$0xff]   ;;  %v1807_v26 = vld [vmem:[%s2217_s6 + $0x18] sm:$0xff]  }
  0x13   : > { %v1796_v23 = vld [vmem:[%s1910_s17 + $0x60] sm:$0xff]   ;;  %v1810_v27 = vld [vmem:[%s2215_s4 + $0x18] sm:$0xff]   ;;  %v1789_v28 = vld [vmem:[%s1910_s17 + $0x28] sm:$0xff]  }
  0x14   : > { %v1805_v24 = vld [vmem:[%s2217_s6 + $0x20] sm:$0xff]   ;;  %v1797_v29 = vld [vmem:[%s1910_s17 + $0x68] sm:$0xff]   ;;  %v1790_v30 = vld [vmem:[%s1910_s17 + $0x30] sm:$0xff]  }
  0x15   : > { %1613 = vmatpush3.bf16.msra.mxu0 %v1778_v2  ;;  %1762 = vmatpush3.bf16.msra.mxu1 %v1778_v2  ;;  %v1808_v25 = vld [vmem:[%s2215_s4 + $0x20] sm:$0xff]   ;;  %v1798_v31 = vld [vmem:[%s1910_s17 + $0x70] sm:$0xff]   ;;  %v1791_v33 = vld [vmem:[%s1910_s17 + $0x38] sm:$0xff]  }
  0x16   : > { %1614 = vmatprep.subr.bf16.mxu0 %v1779_v3  ;;  %1755 = vmatprep.subr.bf16.mxu1 %v1779_v3  ;;  %v1809_v32 = vld [vmem:[%s2217_s6 + $0x10] sm:$0xff]   ;;  %v1799_v34 = vld [vmem:[%s1910_s17 + $0x78] sm:$0xff]   ;;  %v1811_v35 = vld [vmem:[%s2217_s6 + $0x8] sm:$0xff]  }
  0x17   : > { %v1812_v36 = vld [vmem:[%s2215_s4 + $0x10] sm:$0xff]   ;;  %v1813_v37 = vld [vmem:[%s2217_s6] sm:$0xff]   ;;  %v1814_v38 = vld [vmem:[%s2215_s4 + $0x8] sm:$0xff]  }
  0x18   : > { %v1815_v39 = vld [vmem:[%s1956_s24] sm:$0xff]   ;;  %v1816_v40 = vld [vmem:[%s1956_s24 + $0x8] sm:$0xff]   ;;  %v1818_v42 = vld [vmem:[%s1956_s24 + $0x10] sm:$0xff]  }
  0x19   : > { %1615 = vmatpush3.bf16.msra.mxu0 %v1779_v3  ;;  %1763 = vmatpush3.bf16.msra.mxu1 %v1779_v3  ;;  %v1817_v41 = vld [vmem:[%s2215_s4] sm:$0xff]   ;;  %v1819_v43 = vld [vmem:[%s1956_s24 + $0x18] sm:$0xff]   ;;  %v1821_v45 = vld [vmem:[%s1956_s24 + $0x28] sm:$0xff]  }
  0x1a   : > { %1616 = vmatprep.subr.bf16.mxu0 %v1780_v5  ;;  %1756 = vmatprep.subr.bf16.mxu1 %v1780_v5  ;;  %v1820_v44 = vld [vmem:[%s1956_s24 + $0x20] sm:$0xff]   ;;  %v1822_v46 = vld [vmem:[%s1956_s24 + $0x30] sm:$0xff]   ;;  %v1823_v47 = vld [vmem:[%s1956_s24 + $0x38] sm:$0xff]  }
  0x1b   : > { %v1824_v48 = vld [vmem:[%s1956_s24 + $0x40] sm:$0xff]   ;;  %v1825_v49 = vld [vmem:[%s1956_s24 + $0x48] sm:$0xff]   ;;  %v1826_v50 = vld [vmem:[%s1956_s24 + $0x50] sm:$0xff]  }
  0x1c   : > { %v1827_v51 = vld [vmem:[%s1956_s24 + $0x58] sm:$0xff]   ;;  %v1828_v52 = vld [vmem:[%s1956_s24 + $0x60] sm:$0xff]   ;;  %v1829_v53 = vld [vmem:[%s1956_s24 + $0x68] sm:$0xff]  }
  0x1d   : > { %1617 = vmatpush3.bf16.msra.mxu0 %v1780_v5  ;;  %1764 = vmatpush3.bf16.msra.mxu1 %v1780_v5  ;;  %v1830_v54 = vld [vmem:[%s1956_s24 + $0x70] sm:$0xff]   ;;  %v1831_v55 = vld [vmem:[%s1956_s24 + $0x78] sm:$0xff]   ;;  %v2019_v60 = vld [vmem:[%s2214_s3] ss:$0 sm:$0xff] }
  0x1e   : > { %1618 = vmatprep.subr.bf16.mxu0 %v1781_v6  ;;  %1757 = vmatprep.subr.bf16.mxu1 %v1781_v6 }
  0x21   : > { %1619 = vmatpush3.bf16.msra.mxu0 %v1781_v6  ;;  %1765 = vmatpush3.bf16.msra.mxu1 %v1781_v6 }
  0x22   : > { %1620 = vmatprep.subr.bf16.mxu0 %v1782_v8  ;;  %1758 = vmatprep.subr.bf16.mxu1 %v1782_v8 }
  0x25   : > { %1621 = vmatpush3.bf16.msra.mxu0 %v1782_v8  ;;  %1766 = vmatpush3.bf16.msra.mxu1 %v1782_v8 }
  0x26   : > { %1622 = vmatprep.subr.bf16.mxu0 %v1783_v9  ;;  %1759 = vmatprep.subr.bf16.mxu1 %v1783_v9 }
  0x29   : > { %1623 = vmatpush3.bf16.msra.mxu0 %v1783_v9  ;;  %1767 = vmatpush3.bf16.msra.mxu1 %v1783_v9 }
  0x2a   : > { %1704 = vmatprep.subr.bf16.mxu0 %v1800_v10  ;;  %1656 = vmatprep.subr.bf16.mxu1 %v1802_v12 }
  0x2c   : > { %1625 = vmatmul.mubr.bf16.vlgmr.msra.gmra.mxu0 %v1785_v11  ;;  %1641 = vmatmul.mubr.bf16.vlgmr.msra.gmra.mxu1 %v1793_v14 }
  0x2d   : > { %1628 = vmatprep.mubr.bf16.mxu0 %v1786_v13  ;;  %1644 = vmatprep.mubr.bf16.mxu1 %v1794_v15 }
  0x2e   : > { %1705 = vmatpush3.bf16.msra.mxu0 %v1800_v10  ;;  %1657 = vmatpush3.bf16.msra.mxu1 %v1802_v12 }
  0x2f   : > { %1706 = vmatprep.subr.bf16.mxu0 %v1801_v16  ;;  %1658 = vmatprep.subr.bf16.mxu1 %v1804_v17 }
  0x32   : > { %1707 = vmatpush3.bf16.msra.mxu0 %v1801_v16  ;;  %1659 = vmatpush3.bf16.msra.mxu1 %v1804_v17 }
  0x33   : > { %1708 = vmatprep.subr.bf16.mxu0 %v1803_v18  ;;  %1660 = vmatprep.subr.bf16.mxu1 %v1806_v19 }
  0x34   : > { %1629 = vmatmul.mubr.bf16.gmra.mxu0 %v1787_v20  ;;  %1645 = vmatmul.mubr.bf16.gmra.mxu1 %v1795_v21 }
  0x35   : > { %1632 = vmatprep.mubr.bf16.mxu0 %v1788_v22  ;;  %1648 = vmatprep.mubr.bf16.mxu1 %v1796_v23 }
  0x36   : > { %1709 = vmatpush3.bf16.msra.mxu0 %v1803_v18  ;;  %1661 = vmatpush3.bf16.msra.mxu1 %v1806_v19 }
  0x37   : > { %1710 = vmatprep.subr.bf16.mxu0 %v1805_v24  ;;  %1662 = vmatprep.subr.bf16.mxu1 %v1808_v25 }
  0x3a   : > { %1711 = vmatpush3.bf16.msra.mxu0 %v1805_v24  ;;  %1663 = vmatpush3.bf16.msra.mxu1 %v1808_v25 }
  0x3b   : > { %1712 = vmatprep.subr.bf16.mxu0 %v1807_v26  ;;  %1664 = vmatprep.subr.bf16.mxu1 %v1810_v27 }
  0x3c   : > { %1633 = vmatmul.mubr.bf16.gmra.mxu0 %v1789_v28  ;;  %1649 = vmatmul.mubr.bf16.gmra.mxu1 %v1797_v29 }
  0x3d   : > { %1636 = vmatprep.mubr.bf16.mxu0 %v1790_v30  ;;  %1652 = vmatprep.mubr.bf16.mxu1 %v1798_v31 }
  0x3e   : > { %1713 = vmatpush3.bf16.msra.mxu0 %v1807_v26  ;;  %1665 = vmatpush3.bf16.msra.mxu1 %v1810_v27 }
  0x3f   : > { %1714 = vmatprep.subr.bf16.mxu0 %v1809_v32  ;;  %1666 = vmatprep.subr.bf16.mxu1 %v1812_v36 }
  0x42   : > { %1715 = vmatpush3.bf16.msra.mxu0 %v1809_v32  ;;  %1667 = vmatpush3.bf16.msra.mxu1 %v1812_v36 }
  0x43   : > { %1716 = vmatprep.subr.bf16.mxu0 %v1811_v35  ;;  %1668 = vmatprep.subr.bf16.mxu1 %v1814_v38 }
  0x44   : > { %1637 = vmatmul.mubr.bf16.gmra.mxu0 %v1791_v33  ;;  %1653 = vmatmul.mubr.bf16.gmra.mxu1 %v1799_v34 }
  0x45   : > { %1720 = vmatprep.mubr.bf16.mxu0 %v1815_v39 }
  0x46   : > { %1717 = vmatpush3.bf16.msra.mxu0 %v1811_v35  ;;  %1669 = vmatpush3.bf16.msra.mxu1 %v1814_v38 }
  0x47   : > { %1718 = vmatprep.subr.bf16.mxu0 %v1813_v37  ;;  %1670 = vmatprep.subr.bf16.mxu1 %v1817_v41 }
  0x4a   : > { %1719 = vmatpush3.bf16.msra.mxu0 %v1813_v37  ;;  %1671 = vmatpush3.bf16.msra.mxu1 %v1817_v41 }
  0x4d   : > { %1721 = vmatmul.mubr.bf16.vlgmr.msra.gmra.mxu0 %v1816_v40 }
  0x4e   : > { %1724 = vmatprep.mubr.bf16.mxu0 %v1818_v42 }
  0x55   : > { %1725 = vmatmul.mubr.bf16.gmra.mxu0 %v1819_v43 }
  0x56   : > { %1728 = vmatprep.mubr.bf16.mxu0 %v1820_v44 }
  0x5d   : > { %1729 = vmatmul.mubr.bf16.gmra.mxu0 %v1821_v45 }
  0x5e   : > { %1732 = vmatprep.mubr.bf16.mxu0 %v1822_v46 }
  0x65   : > { %1733 = vmatmul.mubr.bf16.gmra.mxu0 %v1823_v47 }
  0x66   : > { %1736 = vmatprep.mubr.bf16.mxu0 %v1824_v48 }
  0x6d   : > { %1737 = vmatmul.mubr.bf16.gmra.mxu0 %v1825_v49 }
  0x6e   : > { %1740 = vmatprep.mubr.bf16.mxu0 %v1826_v50 }
  0x75   : > { %1741 = vmatmul.mubr.bf16.gmra.mxu0 %v1827_v51 }
  0x76   : > { %1744 = vmatprep.mubr.bf16.mxu0 %v1828_v52 }
  0x7d   : > { %1745 = vmatmul.mubr.bf16.gmra.mxu0 %v1829_v53 }
  0x7e   : > { %1748 = vmatprep.mubr.bf16.mxu0 %v1830_v54 }
  0x85   : > { %1749 = vmatmul.mubr.bf16.gmra.mxu0 %v1831_v55 }
  0xec   : > { %v1626_v56 = vpop.f32.mrf.mxu0  ;;  %v2014_v57 = vpop.f32.mrf.mxu1 }
  0xed   : > { %v574_v1 = vadd.f32 %v1626_v56, %v2019_v60 }
  0xee   : > { %v565_v58 = vpop.f32.mrf.mxu0  ;;  %v629_v59 = vpop.f32.mrf.mxu1 }
  0xef   : > { %v566_v63 = vadd.f32 %v2019_v60, %v565_v58  ;;  %v694_v10 = vmax.f32 %v574_v1, 0.0  ;;  %v630_v46 = vadd.f32 %v2019_v60, %v629_v59 }
  0xf0   : > { %v1627_v61 = vpop.f32.mrf.mxu0  ;;  %v2021_v62 = vpop.f32.mrf.mxu1 }
  0xf1   : > { %v577_v0 = vadd.f32 %v1627_v61, %v2019_v60  ;;  %v692_v8 = vmax.f32 %v566_v63, 0.0  ;;  %v708_v55 = vmax.f32 %v630_v46, 0.0 }
  0xf2   : > { %v568_v2 = vpop.f32.mrf.mxu0  ;;  %v632_v3 = vpop.f32.mrf.mxu1 }
  0xf3   : > { %v569_v4 = vadd.f32 %v2019_v60, %v568_v2  ;;  %v695_v5 = vmax.f32 %v577_v0, 0.0  ;;  %v633_v47 = vadd.f32 %v2019_v60, %v632_v3 }
  0xf4   : > { %v1630_v6 = vpop.f32.mrf.mxu0  ;;  %v2027_v7 = vpop.f32.mrf.mxu1 }
  0xf5   : > { %v693_v9 = vmax.f32 %v569_v4, 0.0  ;;  %v725_v14 = vpack.c.bf16 %v695_v5, %v694_v10  ;;  %v590_v19 = vadd.f32 %v1630_v6, %v2019_v60  ;;  %v709_v58 = vmax.f32 %v633_v47, 0.0 }
  0xf6   : > { %v581_v11 = vpop.f32.mrf.mxu0  ;;  %v645_v12 = vpop.f32.mrf.mxu1  ;;  %v638_v6 = vadd.f32 %v2014_v57, %v2019_v60  ;;  %v654_v57 = vadd.f32 %v2027_v7, %v2019_v60 }
  0xf7   : > { %v724_v13 = vpack.c.bf16 %v693_v9, %v692_v8  ;;  %v582_v17 = vadd.f32 %v2019_v60, %v581_v11  ;;  %v698_v27 = vmax.f32 %v590_v19, 0.0  ;;  %v732_v3 = vpack.c.bf16 %v709_v58, %v708_v55 }
  0xf8   : > { %v1631_v15 = vpop.f32.mrf.mxu0  ;;  %v2029_v16 = vpop.f32.mrf.mxu1  ;;  %v646_v4 = vadd.f32 %v2019_v60, %v645_v12  ;;  %v641_v9 = vadd.f32 %v2021_v62, %v2019_v60 }
  0xf9   : > { %v593_v18 = vadd.f32 %v1631_v15, %v2019_v60  ;;  %1672 = vmatprep.mubr.bf16.mxu1 %v724_v13  ;;  %v696_v25 = vmax.f32 %v582_v17, 0.0  ;;  %v657_v62 = vadd.f32 %v2029_v16, %v2019_v60 }
  0xfa   : > { %v584_v20 = vpop.f32.mrf.mxu0  ;;  %1673 = vmatmul.mubr.bf16.vlgmr.msra.gmra.mxu1 %v725_v14  ;;  %v648_v24 = vpop.f32.mrf.mxu1  ;;  %v712_v11 = vmax.f32 %v646_v4, 0.0  ;;  %v710_v14 = vmax.f32 %v638_v6, 0.0  ;;  %v711_v15 = vmax.f32 %v641_v9, 0.0 }
  0xfb   : > { %v585_v21 = vadd.f32 %v2019_v60, %v584_v20  ;;  %v699_v22 = vmax.f32 %v593_v18, 0.0  ;;  %v649_v5 = vadd.f32 %v2019_v60, %v648_v24  ;;  %v714_v24 = vmax.f32 %v654_v57, 0.0 }
  0xfc   : > { %v1634_v23 = vpop.f32.mrf.mxu0  ;;  %v2035_v32 = vpop.f32.mrf.mxu1  ;;  %v733_v20 = vpack.c.bf16 %v711_v15, %v710_v14 }
  0xfd   : > { %v697_v26 = vmax.f32 %v585_v21, 0.0  ;;  %v727_v30 = vpack.c.bf16 %v699_v22, %v698_v27  ;;  %v606_v35 = vadd.f32 %v1634_v23, %v2019_v60  ;;  %v713_v13 = vmax.f32 %v649_v5, 0.0 }
  0xfe   : > { %v597_v28 = vpop.f32.mrf.mxu0  ;;  %v661_v40 = vpop.f32.mrf.mxu1  ;;  %v670_v7 = vadd.f32 %v2035_v32, %v2019_v60 }
  0xff   : > { %v726_v29 = vpack.c.bf16 %v697_v26, %v696_v25  ;;  %v598_v33 = vadd.f32 %v2019_v60, %v597_v28  ;;  %v702_v43 = vmax.f32 %v606_v35, 0.0  ;;  %v734_v18 = vpack.c.bf16 %v713_v13, %v712_v11 }
 0x100   : > { %v1635_v31 = vpop.f32.mrf.mxu0  ;;  %v1651_v50 = vpop.f32.mrf.mxu1  ;;  %v662_v12 = vadd.f32 %v2019_v60, %v661_v40  ;;  %v715_v25 = vmax.f32 %v657_v62, 0.0 }
 0x101   : > { %v609_v34 = vadd.f32 %v1635_v31, %v2019_v60  ;;  %1676 = vmatprep.mubr.bf16.mxu1 %v726_v29  ;;  %v700_v41 = vmax.f32 %v598_v33, 0.0  ;;  %v673_v31 = vadd.f32 %v1651_v50, %v2019_v60 }
 0x102   : > { %v600_v36 = vpop.f32.mrf.mxu0  ;;  %1677 = vmatmul.mubr.bf16.gmra.mxu1 %v727_v30  ;;  %v664_v59 = vpop.f32.mrf.mxu1  ;;  %v716_v22 = vmax.f32 %v662_v12, 0.0  ;;  %v735_v30 = vpack.c.bf16 %v715_v25, %v714_v24 }
 0x103   : > { %v601_v37 = vadd.f32 %v2019_v60, %v600_v36  ;;  %v703_v38 = vmax.f32 %v609_v34, 0.0  ;;  %v665_v19 = vadd.f32 %v2019_v60, %v664_v59  ;;  %v718_v34 = vmax.f32 %v670_v7, 0.0 }
 0x104   : > { %v1638_v39 = vpop.f32.mrf.mxu0  ;;  %v1654_v10 = vpop.f32.mrf.mxu1  ;;  %v719_v35 = vmax.f32 %v673_v31, 0.0 }
 0x105   : > { %v701_v42 = vmax.f32 %v601_v37, 0.0  ;;  %v729_v48 = vpack.c.bf16 %v703_v38, %v702_v43  ;;  %v622_v53 = vadd.f32 %v1638_v39, %v2019_v60  ;;  %v717_v23 = vmax.f32 %v665_v19, 0.0 }
 0x106   : > { %v613_v44 = vpop.f32.mrf.mxu0  ;;  %v677_v17 = vpop.f32.mrf.mxu1  ;;  %v737_v37 = vpack.c.bf16 %v719_v35, %v718_v34  ;;  %v686_v38 = vadd.f32 %v1654_v10, %v2019_v60 }
 0x107   : > { %v728_v45 = vpack.c.bf16 %v701_v42, %v700_v41  ;;  %v614_v51 = vadd.f32 %v2019_v60, %v613_v44  ;;  %v706_v1 = vmax.f32 %v622_v53, 0.0  ;;  %v736_v27 = vpack.c.bf16 %v717_v23, %v716_v22 }
 0x108   : > { %v1639_v49 = vpop.f32.mrf.mxu0  ;;  %v1655_v21 = vpop.f32.mrf.mxu1  ;;  %v678_v28 = vadd.f32 %v2019_v60, %v677_v17  ;;  %v722_v40 = vmax.f32 %v686_v38, 0.0 }
 0x109   : > { %v625_v52 = vadd.f32 %v1639_v49, %v2019_v60  ;;  %1680 = vmatprep.mubr.bf16.mxu1 %v728_v45  ;;  %v704_v63 = vmax.f32 %v614_v51, 0.0  ;;  %v689_v39 = vadd.f32 %v1655_v21, %v2019_v60 }
 0x10a   : > { %v616_v54 = vpop.f32.mrf.mxu0  ;;  %1681 = vmatmul.mubr.bf16.gmra.mxu1 %v729_v48  ;;  %v680_v26 = vpop.f32.mrf.mxu1  ;;  %v720_v16 = vmax.f32 %v678_v28, 0.0 }
 0x10b   : > { %v617_v56 = vadd.f32 %v2019_v60, %v616_v54  ;;  %v707_v61 = vmax.f32 %v625_v52, 0.0  ;;  %v681_v29 = vadd.f32 %v2019_v60, %v680_v26  ;;  %v723_v41 = vmax.f32 %v689_v39, 0.0 }
 0x10d   : > { %v705_v0 = vmax.f32 %v617_v56, 0.0  ;;  %v731_v8 = vpack.c.bf16 %v707_v61, %v706_v1  ;;  %v721_v33 = vmax.f32 %v681_v29, 0.0  ;;  %v739_v42 = vpack.c.bf16 %v723_v41, %v722_v40  ;;  %v1722_v32 = vpop.f32.mrf.mxu0  ;;  %v2079_v56 = vld [vmem:[%s2218_s7] ss:$0 sm:$0xff] }
 0x10e   : > { %v2086_v61 = vld [vmem:[%s2216_s5] ss:$0 sm:$0xff]  ;;  %v1214_v59 = vadd.f32 %v1722_v32, %v2079_v56 }
 0x10f   : > { %v730_v2 = vpack.c.bf16 %v705_v0, %v704_v63  ;;  %v738_v36 = vpack.c.bf16 %v721_v33, %v720_v16  ;;  %v1205_v43 = vpop.f32.mrf.mxu0 }
 0x111   : > { %1684 = vmatprep.mubr.bf16.mxu1 %v730_v2  ;;  %v1723_v44 = vpop.f32.mrf.mxu0 }
 0x112   : > { %1685 = vmatmul.mubr.bf16.gmra.mxu1 %v731_v8  ;;  %v1217_v9 = vadd.f32 %v1723_v44, %v2079_v56 }
 0x113   : > { %1688 = vmatprep.mubr.bf16.mxu1 %v732_v3  ;;  %v1208_v45 = vpop.f32.mrf.mxu0  ;;  %v1206_v3 = vadd.f32 %v2079_v56, %v1205_v43 }
 0x114   : > { %v1209_v14 = vadd.f32 %v2079_v56, %v1208_v45 }
 0x115   : > { %v1726_v46 = vpop.f32.mrf.mxu0 }
 0x116   : > { %v1230_v15 = vadd.f32 %v1726_v46, %v2079_v56 }
 0x117   : > { %v1221_v47 = vpop.f32.mrf.mxu0 }
 0x118   : > { %v1222_v21 = vadd.f32 %v2079_v56, %v1221_v47 }
 0x119   : > { %v1727_v48 = vpop.f32.mrf.mxu0 }
 0x11a   : > { %1689 = vmatmul.mubr.bf16.gmra.mxu1 %v733_v20  ;;  %v1233_v26 = vadd.f32 %v1727_v48, %v2079_v56 }
 0x11b   : > { %1692 = vmatprep.mubr.bf16.mxu1 %v734_v18  ;;  %v1224_v49 = vpop.f32.mrf.mxu0 }
 0x11d   : > { %v1730_v50 = vpop.f32.mrf.mxu0 }
 0x11e   : > { %v1246_v7 = vadd.f32 %v1730_v50, %v2079_v56 }
 0x11f   : > { %v1237_v51 = vpop.f32.mrf.mxu0 }
 0x120   : > { %v1238_v38 = vadd.f32 %v2079_v56, %v1237_v51 }
 0x121   : > { %v2066_v52 = vpop.f32.mrf.mxu0 }
 0x122   : > { %1693 = vmatmul.mubr.bf16.gmra.mxu1 %v735_v30  ;;  %v1225_v30 = vadd.f32 %v2079_v56, %v1224_v49  ;;  %v1249_v32 = vadd.f32 %v2066_v52, %v2079_v56 }
 0x123   : > { %1696 = vmatprep.mubr.bf16.mxu1 %v736_v27  ;;  %v2068_v60 = vpop.f32.mrf.mxu0 }
 0x124   : > { %v1241_v46 = vadd.f32 %v2079_v56, %v2068_v60 }
 0x125   : > { %v2070_v53 = vpop.f32.mrf.mxu0 }
 0x126   : > { %v1262_v47 = vadd.f32 %v2070_v53, %v2079_v56 }
 0x127   : > { %v2072_v54 = vpop.f32.mrf.mxu0 }
 0x129   : > { %v2074_v55 = vpop.f32.mrf.mxu0 }
 0x12a   : > { %1697 = vmatmul.mubr.bf16.gmra.mxu1 %v737_v37 }
 0x12b   : > { %1700 = vmatprep.mubr.bf16.mxu1 %v738_v36  ;;  %v2081_v58 = vpop.f32.mrf.mxu0 }
 0x12d   : > { %v2090_v0 = vpop.f32.mrf.mxu0 }
 0x12f   : > { %v2100_v8 = vpop.f32.mrf.mxu0 }
 0x131   : > { %v2109_v19 = vpop.f32.mrf.mxu0 }
 0x132   : > { %1701 = vmatmul.mubr.bf16.gmra.mxu1 %v739_v42 }
 0x133   : > { %v2116_v25 = vpop.f32.mrf.mxu0 }
 0x135   : > { %v1742_v34 = vpop.f32.mrf.mxu0 }
 0x137   : > { %v1285_v42 = vpop.f32.mrf.mxu0 }
 0x139   : > { %v1743_v51 = vpop.f32.mrf.mxu0 }
 0x1ba   : > { %v1674_v63 = vpop.f32.mrf.mxu1 }
 0x1bb   : > { %v854_v1 = vadd.f32 %v1674_v63, %v2086_v61 }
 0x1bc   : > { %v845_v2 = vpop.f32.mrf.mxu1 }
 0x1bd   : > { %v1334_v4 = vadd.f32 %v1214_v59, %v854_v1  ;;  %v846_v5 = vadd.f32 %v2086_v61, %v845_v2  ;;  %v1254_v1 = vadd.f32 %v2079_v56, %v2072_v54  ;;  %v1278_v54 = vadd.f32 %v2090_v0, %v2079_v56 }
 0x1be   : > { %v1675_v6 = vpop.f32.mrf.mxu1 }
 0x1bf   : > { %1366 = vst [vmem:[%s2096_s13 + $0x10] sm:$0xff] %v1334_v4  ;;  %v1332_v10 = vadd.f32 %v1206_v3, %v846_v5  ;;  %v857_v11 = vadd.f32 %v1675_v6, %v2086_v61  ;;  %v1288_v3 = vpop.f32.mrf.mxu0  ;;  %v1265_v4 = vadd.f32 %v2074_v55, %v2079_v56 }
 0x1c0   : > { %v848_v13 = vpop.f32.mrf.mxu1 }
 0x1c1   : > { %1364 = vst [vmem:[%s2096_s13] sm:$0xff] %v1332_v10  ;;  %v1335_v17 = vadd.f32 %v1217_v9, %v857_v11  ;;  %v849_v18 = vadd.f32 %v2086_v61, %v848_v13  ;;  %v1257_v10 = vadd.f32 %v2079_v56, %v2081_v58 }
 0x1c2   : > { %v1678_v12 = vpop.f32.mrf.mxu1 }
 0x1c3   : > { %1367 = vst [vmem:[%s2096_s13 + $0x18] sm:$0xff] %v1335_v17  ;;  %v1333_v20 = vadd.f32 %v1209_v14, %v849_v18  ;;  %v870_v57 = vadd.f32 %v1678_v12, %v2086_v61  ;;  %v1270_v12 = vadd.f32 %v2079_v56, %v2100_v8  ;;  %v1294_v8 = vadd.f32 %v1742_v34, %v2079_v56 }
 0x1c4   : > { %v861_v62 = vpop.f32.mrf.mxu1 }
 0x1c5   : > { %1365 = vst [vmem:[%s2096_s13 + $0x8] sm:$0xff] %v1333_v20  ;;  %v1338_v22 = vadd.f32 %v1230_v15, %v870_v57  ;;  %v862_v23 = vadd.f32 %v2086_v61, %v861_v62  ;;  %v1746_v15 = vpop.f32.mrf.mxu0  ;;  %v1281_v62 = vadd.f32 %v2109_v19, %v2079_v56 }
 0x1c6   : > { %v1679_v24 = vpop.f32.mrf.mxu1 }
 0x1c7   : > { %1370 = vst [vmem:[%s2096_s13 + $0x30] sm:$0xff] %v1338_v22  ;;  %v1336_v27 = vadd.f32 %v1222_v21, %v862_v23  ;;  %v873_v28 = vadd.f32 %v1679_v24, %v2086_v61  ;;  %v1301_v57 = vpop.f32.mrf.mxu0  ;;  %v1273_v24 = vadd.f32 %v2079_v56, %v2116_v25 }
 0x1c8   : > { %v864_v29 = vpop.f32.mrf.mxu1 }
 0x1c9   : > { %1368 = vst [vmem:[%s2096_s13 + $0x20] sm:$0xff] %v1336_v27  ;;  %v1339_v31 = vadd.f32 %v1233_v26, %v873_v28  ;;  %v865_v16 = vadd.f32 %v2086_v61, %v864_v29  ;;  %v1747_v29 = vpop.f32.mrf.mxu0 }
 0x1ca   : > { %v1682_v33 = vpop.f32.mrf.mxu1 }
 0x1cb   : > { %1371 = vst [vmem:[%s2096_s13 + $0x38] sm:$0xff] %v1339_v31  ;;  %v1337_v35 = vadd.f32 %v1225_v30, %v865_v16  ;;  %v886_v36 = vadd.f32 %v1682_v33, %v2086_v61  ;;  %v1286_v31 = vadd.f32 %v2079_v56, %v1285_v42  ;;  %v1304_v34 = vpop.f32.mrf.mxu0 }
 0x1cc   : > { %v877_v37 = vpop.f32.mrf.mxu1 }
 0x1cd   : > { %1369 = vst [vmem:[%s2096_s13 + $0x28] sm:$0xff] %v1337_v35  ;;  %v1342_v39 = vadd.f32 %v1246_v7, %v886_v36  ;;  %v878_v40 = vadd.f32 %v2086_v61, %v877_v37  ;;  %v1297_v35 = vadd.f32 %v1743_v51, %v2079_v56 }
 0x1ce   : > { %v1683_v41 = vpop.f32.mrf.mxu1 }
 0x1cf   : > { %1374 = vst [vmem:[%s2096_s13 + $0x50] sm:$0xff] %v1342_v39  ;;  %v1340_v43 = vadd.f32 %v1238_v38, %v878_v40  ;;  %v889_v44 = vadd.f32 %v1683_v41, %v2086_v61  ;;  %v1289_v39 = vadd.f32 %v2079_v56, %v1288_v3  ;;  %v1310_v40 = vadd.f32 %v1746_v15, %v2079_v56 }
 0x1d0   : > { %v880_v45 = vpop.f32.mrf.mxu1 }
 0x1d1   : > { %1372 = vst [vmem:[%s2096_s13 + $0x40] sm:$0xff] %v1340_v43  ;;  %v1343_v48 = vadd.f32 %v1249_v32, %v889_v44  ;;  %v881_v49 = vadd.f32 %v2086_v61, %v880_v45  ;;  %v1750_v43 = vpop.f32.mrf.mxu0 }
 0x1d2   : > { %v1686_v50 = vpop.f32.mrf.mxu1 }
 0x1d3   : > { %1375 = vst [vmem:[%s2096_s13 + $0x58] sm:$0xff] %v1343_v48  ;;  %v1341_v52 = vadd.f32 %v1241_v46, %v881_v49  ;;  %v902_v59 = vadd.f32 %v1686_v50, %v2086_v61  ;;  %v1317_v51 = vpop.f32.mrf.mxu0 }
 0x1d4   : > { %v893_v63 = vpop.f32.mrf.mxu1 }
 0x1d5   : > { %1373 = vst [vmem:[%s2096_s13 + $0x48] sm:$0xff] %v1341_v52  ;;  %v1346_v60 = vadd.f32 %v1262_v47, %v902_v59  ;;  %v894_v53 = vadd.f32 %v2086_v61, %v893_v63  ;;  %v1302_v47 = vadd.f32 %v2079_v56, %v1301_v57  ;;  %v1313_v52 = vadd.f32 %v1747_v29, %v2079_v56 }
 0x1d6   : > { %v1687_v2 = vpop.f32.mrf.mxu1 }
 0x1d7   : > { %1378 = vst [vmem:[%s2096_s13 + $0x70] sm:$0xff] %v1346_v60  ;;  %v1344_v5 = vadd.f32 %v1254_v1, %v894_v53  ;;  %v905_v6 = vadd.f32 %v1687_v2, %v2086_v61  ;;  %v1305_v60 = vadd.f32 %v2079_v56, %v1304_v34  ;;  %v1326_v53 = vadd.f32 %v1750_v43, %v2079_v56 }
 0x1d8   : > { %v896_v9 = vpop.f32.mrf.mxu1 }
 0x1d9   : > { %1376 = vst [vmem:[%s2096_s13 + $0x60] sm:$0xff] %v1344_v5  ;;  %v1347_v11 = vadd.f32 %v1265_v4, %v905_v6  ;;  %v897_v13 = vadd.f32 %v2086_v61, %v896_v9  ;;  %v1751_v4 = vpop.f32.mrf.mxu0 }
 0x1da   : > { %v1690_v14 = vpop.f32.mrf.mxu1 }
 0x1db   : > { %1379 = vst [vmem:[%s2096_s13 + $0x78] sm:$0xff] %v1347_v11  ;;  %v1345_v55 = vadd.f32 %v1257_v10, %v897_v13  ;;  %v918_v17 = vadd.f32 %v1690_v14, %v2086_v61  ;;  %v1320_v14 = vpop.f32.mrf.mxu0 }
 0x1dc   : > { %v909_v18 = vpop.f32.mrf.mxu1 }
 0x1dd   : > { %1377 = vst [vmem:[%s2096_s13 + $0x68] sm:$0xff] %v1345_v55  ;;  %v1350_v58 = vadd.f32 %v1278_v54, %v918_v17  ;;  %v910_v0 = vadd.f32 %v2086_v61, %v909_v18  ;;  %v1318_v54 = vadd.f32 %v2079_v56, %v1317_v51  ;;  %v1329_v55 = vadd.f32 %v1751_v4, %v2079_v56 }
 0x1de   : > { %v1691_v20 = vpop.f32.mrf.mxu1 }
 0x1df   : > { %1382 = vst [vmem:[%s2096_s13 + $0x90] sm:$0xff] %v1350_v58  ;;  %v1348_v21 = vadd.f32 %v1270_v12, %v910_v0  ;;  %v921_v22 = vadd.f32 %v1691_v20, %v2086_v61  ;;  %v1321_v58 = vadd.f32 %v2079_v56, %v1320_v14 }
 0x1e0   : > { %v912_v23 = vpop.f32.mrf.mxu1 }
 0x1e1   : > { %1380 = vst [vmem:[%s2096_s13 + $0x80] sm:$0xff] %v1348_v21  ;;  %v1351_v26 = vadd.f32 %v1281_v62, %v921_v22  ;;  %v913_v27 = vadd.f32 %v2086_v61, %v912_v23 }
 0x1e2   : > { %v1694_v28 = vpop.f32.mrf.mxu1 }
 0x1e3   : > { %1383 = vst [vmem:[%s2096_s13 + $0x98] sm:$0xff] %v1351_v26  ;;  %v1349_v19 = vadd.f32 %v1273_v24, %v913_v27  ;;  %v934_v30 = vadd.f32 %v1694_v28, %v2086_v61 }
 0x1e4   : > { %v925_v7 = vpop.f32.mrf.mxu1 }
 0x1e5   : > { %1381 = vst [vmem:[%s2096_s13 + $0x88] sm:$0xff] %v1349_v19  ;;  %v1354_v16 = vadd.f32 %v1294_v8, %v934_v30  ;;  %v926_v25 = vadd.f32 %v2086_v61, %v925_v7 }
 0x1e6   : > { %v1695_v33 = vpop.f32.mrf.mxu1 }
 0x1e7   : > { %1386 = vst [vmem:[%s2096_s13 + $0xb0] sm:$0xff] %v1354_v16  ;;  %v1352_v36 = vadd.f32 %v1286_v31, %v926_v25  ;;  %v937_v37 = vadd.f32 %v1695_v33, %v2086_v61 }
 0x1e8   : > { %v928_v38 = vpop.f32.mrf.mxu1 }
 0x1e9   : > { %1384 = vst [vmem:[%s2096_s13 + $0xa0] sm:$0xff] %v1352_v36  ;;  %v1355_v41 = vadd.f32 %v1297_v35, %v937_v37  ;;  %v929_v42 = vadd.f32 %v2086_v61, %v928_v38 }
 0x1ea   : > { %v1698_v32 = vpop.f32.mrf.mxu1 }
 0x1eb   : > { %1387 = vst [vmem:[%s2096_s13 + $0xb8] sm:$0xff] %v1355_v41  ;;  %v1353_v44 = vadd.f32 %v1289_v39, %v929_v42  ;;  %v950_v45 = vadd.f32 %v1698_v32, %v2086_v61 }
 0x1ec   : > { %v941_v46 = vpop.f32.mrf.mxu1 }
 0x1ed   : > { %1385 = vst [vmem:[%s2096_s13 + $0xa8] sm:$0xff] %v1353_v44  ;;  %v1358_v48 = vadd.f32 %v1310_v40, %v950_v45  ;;  %v942_v49 = vadd.f32 %v2086_v61, %v941_v46 }
 0x1ee   : > { %v1699_v50 = vpop.f32.mrf.mxu1 }
 0x1ef   : > { %1390 = vst [vmem:[%s2096_s13 + $0xd0] sm:$0xff] %v1358_v48  ;;  %v1356_v59 = vadd.f32 %v1302_v47, %v942_v49  ;;  %v953_v63 = vadd.f32 %v1699_v50, %v2086_v61 }
 0x1f0   : > { %v944_v1 = vpop.f32.mrf.mxu1 }
 0x1f1   : > { %1388 = vst [vmem:[%s2096_s13 + $0xc0] sm:$0xff] %v1356_v59  ;;  %v1359_v2 = vadd.f32 %v1313_v52, %v953_v63  ;;  %v945_v3 = vadd.f32 %v2086_v61, %v944_v1 }
 0x1f2   : > { %v1702_v5 = vpop.f32.mrf.mxu1 }
 0x1f3   : > { %1391 = vst [vmem:[%s2096_s13 + $0xd8] sm:$0xff] %v1359_v2  ;;  %v1357_v6 = vadd.f32 %v1305_v60, %v945_v3  ;;  %v966_v9 = vadd.f32 %v1702_v5, %v2086_v61 }
 0x1f4   : > { %v957_v10 = vpop.f32.mrf.mxu1 }
 0x1f5   : > { %1389 = vst [vmem:[%s2096_s13 + $0xc8] sm:$0xff] %v1357_v6  ;;  %v1362_v11 = vadd.f32 %v1326_v53, %v966_v9  ;;  %v958_v13 = vadd.f32 %v2086_v61, %v957_v10 }
 0x1f6   : > { %v1703_v15 = vpop.f32.mrf.mxu1 }
 0x1f7   : > { %1394 = vst [vmem:[%s2096_s13 + $0xf0] sm:$0xff] %v1362_v11  ;;  %v1360_v17 = vadd.f32 %v1318_v54, %v958_v13  ;;  %v969_v18 = vadd.f32 %v1703_v15, %v2086_v61 }
 0x1f8   : > { %v960_v12 = vpop.f32.mrf.mxu1 }
 0x1f9   : > { %1392 = vst [vmem:[%s2096_s13 + $0xe0] sm:$0xff] %v1360_v17  ;;  %v1363_v0 = vadd.f32 %v1329_v55, %v969_v18  ;;  %v961_v20 = vadd.f32 %v2086_v61, %v960_v12 }
 0x1fb   : > { %1395 = vst [vmem:[%s2096_s13 + $0xf8] sm:$0xff] %v1363_v0  ;;  %v1361_v57 = vadd.f32 %v1321_v58, %v961_v20 }
 0x1fd   : > { %1393 = vst [vmem:[%s2096_s13 + $0xe8] sm:$0xff] %v1361_v57 }
 0x1fe PF: > { %s18_s27 = sadd.s32 1, %s1838_s27  }
 0x1ff   : > { %p15_p4 = scmp.ge.s32.totalorder %s18_s27, 4  }
 0x201   :  { %17 = sbr.rel (!%p15_p4) target bundleno = 1 (0x1), region = 85 }

// kernel: convnext_forward.3
= control target key start
LH: loop header
LB: loop body
LE: loop exit
PB: predicated region body
PF: predicated region fallthrough
CT: control target
= control target key end

     0   :  { %s1799_s12 = smov 0   ;;  %s1801_s13 = smov 0   ;;  %s2289_s0 = inlined_call_operand.vmem [shape: f32[2,22,22,128], index: 0, kind: input, shape index: {}]   ;;  %s2290_s1 = inlined_call_operand.vmem [shape: f32[49,1,128], index: 1, kind: input, shape index: {}]   ;;  %s2291_s2 = inlined_call_operand.vmem [shape: bf16[2,16,16,128], index: 2, kind: output, shape index: {0}]   ;;  %s2292_s3 = inlined_call_operand.vmem [shape: f32[2,2,128], index: 3, kind: output, shape index: {1}]  }
   0x1   :  { %s1803_s14 = smov 0  }
   0x2 LB: > { %s26_s15 = sadd.s32 1, %s1761_s13  ;;  %p1547_p0 = scmp.ge.s32.totalorder %s1765_s14, 1  ;;  %s1765_s14 = sphi %s1803_s14, %s14_s14   ;;  %s1761_s13 = sphi %s1801_s13, %s2296_s13   ;;  %s1757_s12 = sphi %s1799_s12, %s2295_s12  }
   0x3   : > { %p28_p1 = scmp.ge.s32.totalorder %s26_s15, 2  ;;  %p169_p2 = scmp.lt.s32.totalorder %s1765_s14, 3 }
   0x5   : > { %s2298_s15 = smov (%p28_p1, %s26_s15), 0  ;;  %p170_p3 = pnand %p1547_p0, %p169_p2 }
   0x6   : > { %p209_p4 = scmp.lt.s32.totalorder (!%p170_p3), %s1757_s12, 1  ;;  %s1836_s28 = smov (!%p170_p3), 0  }
   0x7   : > { %173 = sbr.rel (%p170_p3) target bundleno = 154 (0x9a), region = 28 }
   0xc   : > { %s2300_s12 = smov (!%p209_p4, %s1757_s12), 1  ;;  %v1832_v0 = vmov 0.0   ;;  %v1834_v1 = vmov 0.0  }
   0xd   : > { %s1682_s16 = smul.u32 528, %s2300_s12  ;;  %s1673_s17 = sshll.u32 %s2300_s12, 7 }
   0xe   : > { %s1820_s20 = scalar_lea.vmem %s2291_s2, %s1673_s17  ;;  %s1551_s21 = sshll.u32 %s2300_s12, 1 }
   0xf   : > { %s1825_s24 = scalar_lea.vmem %s2289_s0, %s1682_s16  ;;  %s1830_s27 = scalar_lea.vmem %s2292_s3, %s1551_s21 }
  0x10 LB: >> { %s243_s29 = smul.u32 24, %s1777_s28  ;;  %v1552_v2 = vld [vmem:[%s2290_s1] ss:$0 sm:$0xff]  ;;  %v1554_v3 = vld [vmem:[%s2290_s1 + $0x1] ss:$0 sm:$0xff]  ;;  %vm273_vm0 = vcmask 1046528   ;;  %s1777_s28 = sphi %s1836_s28, %s240_s28   ;;  %v1773_v1 = vphi %v1834_v1, %v2294_v1   ;;  %v1769_v0 = vphi %v1832_v0, %v2293_v0  }
  0x11   : >> { %v1556_v4 = vld [vmem:[%s2290_s1 + $0x2] ss:$0 sm:$0xff]  ;;  %v1558_v5 = vld [vmem:[%s2290_s1 + $0x3] ss:$0 sm:$0xff]  ;;  %vm297_vm1 = vcmask 1045504   ;;  %vm321_vm2 = vcmask 1044480  }
  0x12   : >> { %s1855_s7 = scalar_lea.vmem %s1825_s24, %s243_s29  ;;  %vm345_vm3 = vcmask 1043456   ;;  %vm369_vm4 = vcmask 1042432   ;;  %v1560_v25 = vld [vmem:[%s2290_s1 + $0x4] ss:$0 sm:$0xff]  ;;  %v1562_v30 = vld [vmem:[%s2290_s1 + $0x5] ss:$0 sm:$0xff] }
  0x13   : >> { %v245_v6 = vld [vmem:[%s1855_s7] sm:$0xff]  ;;  %v246_v7 = vld [vmem:[%s1855_s7 + $0x8] sm:$0xff]  ;;  %v1866_v8 = vld [vmem:[%s1855_s7 + $0x10] sm:$0x3f]  ;;  %vm393_vm5 = vcmask 1041408   ;;  %s1676_s5 = sshll.u32 %s1777_s28, 3 }
  0x14   : >> { %v255_v9 = vmul.f32 %v1552_v2, %v245_v6  ;;  %v256_v10 = vmul.f32 %v1552_v2, %v246_v7  ;;  %v267_v11 = vmul.f32 %v1554_v3, %v245_v6  ;;  %v268_v12 = vmul.f32 %v1554_v3, %v246_v7  ;;  %v1564_v43 = vld [vmem:[%s2290_s1 + $0x6] ss:$0 sm:$0xff]  ;;  %v1889_v56 = vld [vmem:[%s1855_s7 + $0x18] sm:$0xff]  ;;  %v1569_v57 = vld [vmem:[%s2290_s1 + $0x7] ss:$0 sm:$0xff]  ;;  %s1349_s6 = scalar_lea.vmem %s1820_s20, %s1676_s5  ;;  %s240_s28 = sadd.s32 1, %s1777_s28  }
  0x15   : >> { %v269_v13 = vmul.f32 %v1554_v3, %v1866_v8  ;;  %v291_v14 = vmul.f32 %v1556_v4, %v245_v6  ;;  %v292_v15 = vmul.f32 %v1556_v4, %v246_v7  ;;  %v293_v16 = vmul.f32 %v1556_v4, %v1866_v8  ;;  %v1897_v62 = vld [vmem:[%s1855_s7 + $0x20] sm:$0xff]  ;;  %p237_p5 = scmp.ge.s32.totalorder %s240_s28, 16  }
  0x16   : >> { %v274_v17 = vrot.slane %v267_v11, 1  ;;  %v275_v18 = vrot.slane %v268_v12, 1  ;;  %v315_v19 = vmul.f32 %v1558_v5, %v245_v6  ;;  %v316_v20 = vmul.f32 %v1558_v5, %v246_v7  ;;  %v1573_v12 = vld [vmem:[%s2290_s1 + $0x9] ss:$0 sm:$0xff] }
  0x17   : >> { %v277_v21 = vrot.slane %v269_v13, 1  ;;  %v298_v22 = vrot.slane %v291_v14, 2  ;;  %v299_v23 = vrot.slane %v292_v15, 2  ;;  %v301_v24 = vrot.slane %v293_v16, 2 }
  0x18   : >> { %v276_v26 = vsel %vm273_vm0, %v274_v17, %v275_v18  ;;  %v317_v27 = vmul.f32 %v1558_v5, %v1866_v8  ;;  %v322_v28 = vrot.slane %v315_v19, 3  ;;  %v323_v29 = vrot.slane %v316_v20, 3  ;;  %v1902_v5 = vld [vmem:[%s1855_s7 + $0x28] sm:$0x3f] }
  0x19   : >> { %v278_v31 = vsel %vm273_vm0, %v275_v18, %v277_v21  ;;  %v281_v32 = vadd.f32 %v276_v26, %v255_v9  ;;  %v300_v33 = vsel %vm297_vm1, %v298_v22, %v299_v23  ;;  %v302_v34 = vsel %vm297_vm1, %v299_v23, %v301_v24  ;;  %v1575_v24 = vld [vmem:[%s2290_s1 + $0xa] ss:$0 sm:$0xff] }
  0x1a   : >> { %v282_v35 = vadd.f32 %v278_v31, %v256_v10  ;;  %v324_v36 = vsel %vm321_vm2, %v322_v28, %v323_v29  ;;  %v325_v37 = vrot.slane %v317_v27, 3  ;;  %v339_v38 = vmul.f32 %v1560_v25, %v245_v6 }
  0x1b   : >> { %v305_v39 = vadd.f32 %v300_v33, %v281_v32  ;;  %v340_v40 = vmul.f32 %v1560_v25, %v246_v7  ;;  %v341_v41 = vmul.f32 %v1560_v25, %v1866_v8  ;;  %v363_v42 = vmul.f32 %v1562_v30, %v245_v6  ;;  %v1577_v33 = vld [vmem:[%s2290_s1 + $0xb] ss:$0 sm:$0xff] }
  0x1c   : >> { %v306_v44 = vadd.f32 %v302_v34, %v282_v35  ;;  %v326_v45 = vsel %vm321_vm2, %v323_v29, %v325_v37  ;;  %v346_v46 = vrot.slane %v339_v38, 4  ;;  %v364_v47 = vmul.f32 %v1562_v30, %v246_v7 }
  0x1d   : >> { %v329_v48 = vadd.f32 %v324_v36, %v305_v39  ;;  %v347_v49 = vrot.slane %v340_v40, 4  ;;  %v349_v50 = vrot.slane %v341_v41, 4  ;;  %v365_v51 = vmul.f32 %v1562_v30, %v1866_v8 }
  0x1e   : >> { %v330_v52 = vadd.f32 %v326_v45, %v306_v44  ;;  %v370_v53 = vrot.slane %v363_v42, 5  ;;  %v371_v54 = vrot.slane %v364_v47, 5  ;;  %v387_v55 = vmul.f32 %v1564_v43, %v245_v6  ;;  %v1571_v6 = vld [vmem:[%s2290_s1 + $0x8] ss:$0 sm:$0xff] }
  0x1f   : >> { %v348_v58 = vsel %vm345_vm3, %v346_v46, %v347_v49  ;;  %v350_v59 = vsel %vm345_vm3, %v347_v49, %v349_v50  ;;  %v373_v60 = vrot.slane %v365_v51, 5  ;;  %v388_v61 = vmul.f32 %v1564_v43, %v246_v7  ;;  %v1579_v46 = vld [vmem:[%s2290_s1 + $0xc] ss:$0 sm:$0xff] }
  0x20   : >> { %v353_v63 = vadd.f32 %v348_v58, %v329_v48  ;;  %v354_v2 = vadd.f32 %v350_v59, %v330_v52  ;;  %v372_v3 = vsel %vm369_vm4, %v370_v53, %v371_v54  ;;  %v389_v4 = vmul.f32 %v1564_v43, %v1866_v8 }
  0x21   : >> { %v374_v9 = vsel %vm369_vm4, %v371_v54, %v373_v60  ;;  %v394_v10 = vrot.slane %v387_v55, 6  ;;  %v395_v11 = vrot.slane %v388_v61, 6  ;;  %v417_v7 = vmul.f32 %v1569_v57, %v1889_v56  ;;  %v1581_v60 = vld [vmem:[%s2290_s1 + $0xd] ss:$0 sm:$0xff] }
  0x22   : >> { %v377_v13 = vadd.f32 %v372_v3, %v353_v63  ;;  %v378_v14 = vadd.f32 %v374_v9, %v354_v2  ;;  %v397_v15 = vrot.slane %v389_v4, 6  ;;  %v418_v8 = vmul.f32 %v1569_v57, %v1897_v62 }
  0x23   : >> { %v396_v16 = vsel %vm393_vm5, %v394_v10, %v395_v11  ;;  %v429_v17 = vmul.f32 %v1571_v6, %v1889_v56  ;;  %v430_v18 = vmul.f32 %v1571_v6, %v1897_v62  ;;  %v431_v19 = vmul.f32 %v1571_v6, %v1902_v5 }
  0x24   : >> { %v398_v20 = vsel %vm393_vm5, %v395_v11, %v397_v15  ;;  %v401_v21 = vadd.f32 %v396_v16, %v377_v13  ;;  %v452_v22 = vmul.f32 %v1573_v12, %v1889_v56  ;;  %v453_v23 = vmul.f32 %v1573_v12, %v1897_v62  ;;  %v1950_v11 = vld [vmem:[%s1855_s7 + $0x30] sm:$0xff] }
  0x25   : >> { %v402_v25 = vadd.f32 %v398_v20, %v378_v14  ;;  %v435_v26 = vrot.slane %v429_v17, 1  ;;  %v436_v27 = vrot.slane %v430_v18, 1  ;;  %v438_v28 = vrot.slane %v431_v19, 1  ;;  %v1964_v20 = vld [vmem:[%s1855_s7 + $0x40] sm:$0x3f] }
  0x26   : >> { %v419_v29 = vadd.f32 %v417_v7, %v401_v21  ;;  %v454_v30 = vmul.f32 %v1573_v12, %v1902_v5  ;;  %v458_v31 = vrot.slane %v452_v22, 2  ;;  %v459_v32 = vrot.slane %v453_v23, 2  ;;  %v1586_v7 = vld [vmem:[%s2290_s1 + $0xe] ss:$0 sm:$0xff]  ;;  %v1588_v21 = vld [vmem:[%s2290_s1 + $0xf] ss:$0 sm:$0xff] }
  0x27   : >> { %v420_v34 = vadd.f32 %v418_v8, %v402_v25  ;;  %v437_v35 = vsel %vm273_vm0, %v435_v26, %v436_v27  ;;  %v439_v36 = vsel %vm273_vm0, %v436_v27, %v438_v28  ;;  %v475_v37 = vmul.f32 %v1575_v24, %v1889_v56  ;;  %v1958_v8 = vld [vmem:[%s1855_s7 + $0x38] sm:$0xff]  ;;  %v1590_v22 = vld [vmem:[%s2290_s1 + $0x10] ss:$0 sm:$0xff] }
  0x28   : >> { %v442_v38 = vadd.f32 %v437_v35, %v419_v29  ;;  %v460_v39 = vsel %vm297_vm1, %v458_v31, %v459_v32  ;;  %v461_v40 = vrot.slane %v454_v30, 2  ;;  %v476_v41 = vmul.f32 %v1575_v24, %v1897_v62 }
  0x29   : >> { %v443_v42 = vadd.f32 %v439_v36, %v420_v34  ;;  %v477_v43 = vmul.f32 %v1575_v24, %v1902_v5  ;;  %v481_v44 = vrot.slane %v475_v37, 3  ;;  %v498_v45 = vmul.f32 %v1577_v33, %v1889_v56  ;;  %v1592_v36 = vld [vmem:[%s2290_s1 + $0x11] ss:$0 sm:$0xff] }
  0x2a   : >> { %v462_v47 = vsel %vm297_vm1, %v459_v32, %v461_v40  ;;  %v465_v48 = vadd.f32 %v460_v39, %v442_v38  ;;  %v482_v49 = vrot.slane %v476_v41, 3  ;;  %v499_v50 = vmul.f32 %v1577_v33, %v1897_v62 }
  0x2b   : >> { %v466_v51 = vadd.f32 %v462_v47, %v443_v42  ;;  %v484_v52 = vrot.slane %v477_v43, 3  ;;  %v500_v53 = vmul.f32 %v1577_v33, %v1902_v5  ;;  %v504_v54 = vrot.slane %v498_v45, 4 }
  0x2c   : >> { %v483_v55 = vsel %vm321_vm2, %v481_v44, %v482_v49  ;;  %v505_v57 = vrot.slane %v499_v50, 4  ;;  %v521_v58 = vmul.f32 %v1579_v46, %v1889_v56  ;;  %v522_v59 = vmul.f32 %v1579_v46, %v1897_v62 }
  0x2d   : >> { %v485_v61 = vsel %vm321_vm2, %v482_v49, %v484_v52  ;;  %v488_v63 = vadd.f32 %v483_v55, %v465_v48  ;;  %v507_v2 = vrot.slane %v500_v53, 4  ;;  %v523_v3 = vmul.f32 %v1579_v46, %v1902_v5  ;;  %v1594_v49 = vld [vmem:[%s2290_s1 + $0x12] ss:$0 sm:$0xff] }
  0x2e   : >> { %v489_v4 = vadd.f32 %v485_v61, %v466_v51  ;;  %v506_v6 = vsel %vm345_vm3, %v504_v54, %v505_v57  ;;  %v527_v9 = vrot.slane %v521_v58, 5  ;;  %v528_v10 = vrot.slane %v522_v59, 5  ;;  %v1596_v54 = vld [vmem:[%s2290_s1 + $0x13] ss:$0 sm:$0xff] }
  0x2f   : >> { %v508_v12 = vsel %vm345_vm3, %v505_v57, %v507_v2  ;;  %v511_v13 = vadd.f32 %v506_v6, %v488_v63  ;;  %v530_v14 = vrot.slane %v523_v3, 5  ;;  %v544_v15 = vmul.f32 %v1581_v60, %v1889_v56 }
  0x30   : >> { %v512_v16 = vadd.f32 %v508_v12, %v489_v4  ;;  %v529_v17 = vsel %vm369_vm4, %v527_v9, %v528_v10  ;;  %v545_v18 = vmul.f32 %v1581_v60, %v1897_v62  ;;  %v546_v19 = vmul.f32 %v1581_v60, %v1902_v5 }
  0x31   : >> { %v531_v56 = vsel %vm369_vm4, %v528_v10, %v530_v14  ;;  %v534_v23 = vadd.f32 %v529_v17, %v511_v13  ;;  %v550_v24 = vrot.slane %v544_v15, 6  ;;  %v573_v25 = vmul.f32 %v1586_v7, %v1950_v11  ;;  %v1598_v14 = vld [vmem:[%s2290_s1 + $0x14] ss:$0 sm:$0xff] }
  0x32   : >> { %v535_v26 = vadd.f32 %v531_v56, %v512_v16  ;;  %v551_v62 = vrot.slane %v545_v18, 6  ;;  %v553_v27 = vrot.slane %v546_v19, 6  ;;  %v574_v5 = vmul.f32 %v1586_v7, %v1958_v8  ;;  %v2011_v19 = vld [vmem:[%s1855_s7 + $0x48] sm:$0xff] }
  0x33   : >> { %v585_v28 = vmul.f32 %v1588_v21, %v1950_v11  ;;  %v586_v29 = vmul.f32 %v1588_v21, %v1958_v8  ;;  %v587_v30 = vmul.f32 %v1588_v21, %v1964_v20  ;;  %v608_v31 = vmul.f32 %v1590_v22, %v1950_v11  ;;  %v1603_v21 = vld [vmem:[%s2290_s1 + $0x15] ss:$0 sm:$0xff] }
  0x34   : >> { %v552_v32 = vsel %vm393_vm5, %v550_v24, %v551_v62  ;;  %v554_v33 = vsel %vm393_vm5, %v551_v62, %v553_v27  ;;  %v609_v34 = vmul.f32 %v1590_v22, %v1958_v8  ;;  %v610_v35 = vmul.f32 %v1590_v22, %v1964_v20 }
  0x35   : >> { %v557_v37 = vadd.f32 %v552_v32, %v534_v23  ;;  %v558_v38 = vadd.f32 %v554_v33, %v535_v26  ;;  %v591_v39 = vrot.slane %v585_v28, 1  ;;  %v592_v40 = vrot.slane %v586_v29, 1  ;;  %v1605_v33 = vld [vmem:[%s2290_s1 + $0x16] ss:$0 sm:$0xff] }
  0x36   : >> { %v594_v41 = vrot.slane %v587_v30, 1  ;;  %v614_v42 = vrot.slane %v608_v31, 2  ;;  %v615_v43 = vrot.slane %v609_v34, 2  ;;  %v617_v44 = vrot.slane %v610_v35, 2  ;;  %v2025_v31 = vld [vmem:[%s1855_s7 + $0x58] sm:$0x3f] }
  0x37   : >> { %v575_v45 = vadd.f32 %v573_v25, %v557_v37  ;;  %v576_v46 = vadd.f32 %v574_v5, %v558_v38  ;;  %v593_v47 = vsel %vm273_vm0, %v591_v39, %v592_v40  ;;  %v631_v48 = vmul.f32 %v1592_v36, %v1950_v11  ;;  %v2019_v25 = vld [vmem:[%s1855_s7 + $0x50] sm:$0xff] }
  0x38   : >> { %v595_v50 = vsel %vm273_vm0, %v592_v40, %v594_v41  ;;  %v616_v51 = vsel %vm297_vm1, %v614_v42, %v615_v43  ;;  %v618_v52 = vsel %vm297_vm1, %v615_v43, %v617_v44  ;;  %v632_v53 = vmul.f32 %v1592_v36, %v1958_v8  ;;  %v1607_v34 = vld [vmem:[%s2290_s1 + $0x17] ss:$0 sm:$0xff] }
  0x39   : >> { %v598_v55 = vadd.f32 %v593_v47, %v575_v45  ;;  %v599_v57 = vadd.f32 %v595_v50, %v576_v46  ;;  %v633_v58 = vmul.f32 %v1592_v36, %v1964_v20  ;;  %v637_v59 = vrot.slane %v631_v48, 3  ;;  %v1609_v48 = vld [vmem:[%s2290_s1 + $0x18] ss:$0 sm:$0xff] }
  0x3a   : >> { %v638_v60 = vrot.slane %v632_v53, 3  ;;  %v654_v61 = vmul.f32 %v1594_v49, %v1950_v11  ;;  %v655_v63 = vmul.f32 %v1594_v49, %v1958_v8  ;;  %v656_v2 = vmul.f32 %v1594_v49, %v1964_v20 }
  0x3b   : >> { %v621_v3 = vadd.f32 %v616_v51, %v598_v55  ;;  %v622_v4 = vadd.f32 %v618_v52, %v599_v57  ;;  %v640_v6 = vrot.slane %v633_v58, 3  ;;  %v677_v9 = vmul.f32 %v1596_v54, %v1950_v11 }
  0x3c   : >> { %v639_v10 = vsel %vm321_vm2, %v637_v59, %v638_v60  ;;  %v660_v7 = vrot.slane %v654_v61, 4  ;;  %v661_v12 = vrot.slane %v655_v63, 4  ;;  %v663_v13 = vrot.slane %v656_v2, 4  ;;  %v1611_v63 = vld [vmem:[%s2290_s1 + $0x19] ss:$0 sm:$0xff] }
  0x3d   : >> { %v641_v15 = vsel %vm321_vm2, %v638_v60, %v640_v6  ;;  %v644_v16 = vadd.f32 %v639_v10, %v621_v3  ;;  %v678_v17 = vmul.f32 %v1596_v54, %v1958_v8  ;;  %v679_v18 = vmul.f32 %v1596_v54, %v1964_v20 }
  0x3e   : >> { %v645_v22 = vadd.f32 %v641_v15, %v622_v4  ;;  %v662_v56 = vsel %vm345_vm3, %v660_v7, %v661_v12  ;;  %v664_v23 = vsel %vm345_vm3, %v661_v12, %v663_v13  ;;  %v683_v24 = vrot.slane %v677_v9, 5  ;;  %v1613_v9 = vld [vmem:[%s2290_s1 + $0x1a] ss:$0 sm:$0xff] }
  0x3f   : >> { %v667_v26 = vadd.f32 %v662_v56, %v644_v16  ;;  %v684_v62 = vrot.slane %v678_v17, 5  ;;  %v686_v27 = vrot.slane %v679_v18, 5  ;;  %v700_v5 = vmul.f32 %v1598_v14, %v1950_v11 }
  0x40   : >> { %v668_v28 = vadd.f32 %v664_v23, %v645_v22  ;;  %v701_v29 = vmul.f32 %v1598_v14, %v1958_v8  ;;  %v702_v30 = vmul.f32 %v1598_v14, %v1964_v20  ;;  %v729_v32 = vmul.f32 %v1603_v21, %v2011_v19 }
  0x41   : >> { %v685_v35 = vsel %vm369_vm4, %v683_v24, %v684_v62  ;;  %v687_v11 = vsel %vm369_vm4, %v684_v62, %v686_v27  ;;  %v706_v36 = vrot.slane %v700_v5, 6  ;;  %v730_v8 = vmul.f32 %v1603_v21, %v2019_v25  ;;  %v1615_v27 = vld [vmem:[%s2290_s1 + $0x1b] ss:$0 sm:$0xff] }
  0x42   : >> { %v690_v20 = vadd.f32 %v685_v35, %v667_v26  ;;  %v691_v37 = vadd.f32 %v687_v11, %v668_v28  ;;  %v707_v38 = vrot.slane %v701_v29, 6  ;;  %v709_v39 = vrot.slane %v702_v30, 6 }
  0x43   : >> { %v741_v40 = vmul.f32 %v1605_v33, %v2011_v19  ;;  %v742_v41 = vmul.f32 %v1605_v33, %v2019_v25  ;;  %v743_v42 = vmul.f32 %v1605_v33, %v2025_v31  ;;  %v764_v43 = vmul.f32 %v1607_v34, %v2011_v19  ;;  %v1620_v33 = vld [vmem:[%s2290_s1 + $0x1c] ss:$0 sm:$0xff] }
  0x44   : >> { %v708_v44 = vsel %vm393_vm5, %v706_v36, %v707_v38  ;;  %v710_v45 = vsel %vm393_vm5, %v707_v38, %v709_v39  ;;  %v765_v46 = vmul.f32 %v1607_v34, %v2019_v25  ;;  %v766_v47 = vmul.f32 %v1607_v34, %v2025_v31 }
  0x45   : >> { %v713_v49 = vadd.f32 %v708_v44, %v690_v20  ;;  %v714_v50 = vadd.f32 %v710_v45, %v691_v37  ;;  %v747_v51 = vrot.slane %v741_v40, 1  ;;  %v748_v52 = vrot.slane %v742_v41, 1  ;;  %v1622_v45 = vld [vmem:[%s2290_s1 + $0x1d] ss:$0 sm:$0xff] }
  0x46   : >> { %v750_v53 = vrot.slane %v743_v42, 1  ;;  %v770_v54 = vrot.slane %v764_v43, 2  ;;  %v771_v55 = vrot.slane %v765_v46, 2  ;;  %v773_v57 = vrot.slane %v766_v47, 2  ;;  %v2087_v43 = vld [vmem:[%s1855_s7 + $0x70] sm:$0x3f] }
  0x47   : >> { %v731_v58 = vadd.f32 %v729_v32, %v713_v49  ;;  %v732_v59 = vadd.f32 %v730_v8, %v714_v50  ;;  %v749_v60 = vsel %vm273_vm0, %v747_v51, %v748_v52  ;;  %v787_v61 = vmul.f32 %v1609_v48, %v2011_v19  ;;  %v2073_v32 = vld [vmem:[%s1855_s7 + $0x60] sm:$0xff]  ;;  %v2081_v8 = vld [vmem:[%s1855_s7 + $0x68] sm:$0xff]  ;;  %v1624_v46 = vld [vmem:[%s2290_s1 + $0x1e] ss:$0 sm:$0xff] }
  0x48   : >> { %v751_v2 = vsel %vm273_vm0, %v748_v52, %v750_v53  ;;  %v772_v3 = vsel %vm297_vm1, %v770_v54, %v771_v55  ;;  %v774_v4 = vsel %vm297_vm1, %v771_v55, %v773_v57  ;;  %v788_v6 = vmul.f32 %v1609_v48, %v2019_v25 }
  0x49   : >> { %v754_v10 = vadd.f32 %v749_v60, %v731_v58  ;;  %v755_v7 = vadd.f32 %v751_v2, %v732_v59  ;;  %v789_v12 = vmul.f32 %v1609_v48, %v2025_v31  ;;  %v793_v13 = vrot.slane %v787_v61, 3  ;;  %v1626_v61 = vld [vmem:[%s2290_s1 + $0x1f] ss:$0 sm:$0xff] }
  0x4a   : >> { %v794_v14 = vrot.slane %v788_v6, 3  ;;  %v810_v15 = vmul.f32 %v1611_v63, %v2011_v19  ;;  %v811_v16 = vmul.f32 %v1611_v63, %v2019_v25  ;;  %v812_v17 = vmul.f32 %v1611_v63, %v2025_v31 }
  0x4b   : >> { %v777_v18 = vadd.f32 %v772_v3, %v754_v10  ;;  %v778_v21 = vadd.f32 %v774_v4, %v755_v7  ;;  %v796_v22 = vrot.slane %v789_v12, 3  ;;  %v833_v56 = vmul.f32 %v1613_v9, %v2011_v19 }
  0x4c   : >> { %v795_v23 = vsel %vm321_vm2, %v793_v13, %v794_v14  ;;  %v816_v24 = vrot.slane %v810_v15, 4  ;;  %v817_v26 = vrot.slane %v811_v16, 4  ;;  %v819_v62 = vrot.slane %v812_v17, 4  ;;  %v1628_v16 = vld [vmem:[%s2290_s1 + $0x20] ss:$0 sm:$0xff] }
  0x4d   : >> { %v797_v5 = vsel %vm321_vm2, %v794_v14, %v796_v22  ;;  %v800_v28 = vadd.f32 %v795_v23, %v777_v18  ;;  %v834_v29 = vmul.f32 %v1613_v9, %v2019_v25  ;;  %v835_v30 = vmul.f32 %v1613_v9, %v2025_v31 }
  0x4e   : >> { %v801_v34 = vadd.f32 %v797_v5, %v778_v21  ;;  %v818_v35 = vsel %vm345_vm3, %v816_v24, %v817_v26  ;;  %v820_v11 = vsel %vm345_vm3, %v817_v26, %v819_v62  ;;  %v839_v36 = vrot.slane %v833_v56, 5  ;;  %v1630_v56 = vld [vmem:[%s2290_s1 + $0x21] ss:$0 sm:$0xff] }
  0x4f   : >> { %v823_v20 = vadd.f32 %v818_v35, %v800_v28  ;;  %v840_v37 = vrot.slane %v834_v29, 5  ;;  %v842_v38 = vrot.slane %v835_v30, 5  ;;  %v856_v39 = vmul.f32 %v1615_v27, %v2011_v19 }
  0x50   : >> { %v824_v40 = vadd.f32 %v820_v11, %v801_v34  ;;  %v857_v41 = vmul.f32 %v1615_v27, %v2019_v25  ;;  %v858_v42 = vmul.f32 %v1615_v27, %v2025_v31  ;;  %v885_v44 = vmul.f32 %v1620_v33, %v2073_v32 }
  0x51   : >> { %v841_v47 = vsel %vm369_vm4, %v839_v36, %v840_v37  ;;  %v843_v19 = vsel %vm369_vm4, %v840_v37, %v842_v38  ;;  %v862_v48 = vrot.slane %v856_v39, 6  ;;  %v886_v25 = vmul.f32 %v1620_v33, %v2081_v8  ;;  %v1632_v38 = vld [vmem:[%s2290_s1 + $0x22] ss:$0 sm:$0xff] }
  0x52   : >> { %v846_v31 = vadd.f32 %v841_v47, %v823_v20  ;;  %v847_v49 = vadd.f32 %v843_v19, %v824_v40  ;;  %v863_v50 = vrot.slane %v857_v41, 6  ;;  %v865_v51 = vrot.slane %v858_v42, 6 }
  0x53   : >> { %v897_v52 = vmul.f32 %v1622_v45, %v2073_v32  ;;  %v898_v53 = vmul.f32 %v1622_v45, %v2081_v8  ;;  %v899_v54 = vmul.f32 %v1622_v45, %v2087_v43  ;;  %v920_v55 = vmul.f32 %v1624_v46, %v2073_v32  ;;  %v1637_v45 = vld [vmem:[%s2290_s1 + $0x23] ss:$0 sm:$0xff] }
  0x54   : >> { %v864_v57 = vsel %vm393_vm5, %v862_v48, %v863_v50  ;;  %v866_v58 = vsel %vm393_vm5, %v863_v50, %v865_v51  ;;  %v921_v59 = vmul.f32 %v1624_v46, %v2081_v8  ;;  %v922_v60 = vmul.f32 %v1624_v46, %v2087_v43 }
  0x55   : >> { %v869_v63 = vadd.f32 %v864_v57, %v846_v31  ;;  %v870_v2 = vadd.f32 %v866_v58, %v847_v49  ;;  %v903_v3 = vrot.slane %v897_v52, 1  ;;  %v904_v4 = vrot.slane %v898_v53, 1  ;;  %v1639_v58 = vld [vmem:[%s2290_s1 + $0x24] ss:$0 sm:$0xff] }
  0x56   : >> { %v906_v6 = vrot.slane %v899_v54, 1  ;;  %v926_v9 = vrot.slane %v920_v55, 2  ;;  %v927_v10 = vrot.slane %v921_v59, 2  ;;  %v929_v7 = vrot.slane %v922_v60, 2  ;;  %v2149_v55 = vld [vmem:[%s1855_s7 + $0x88] sm:$0x3f] }
  0x57   : >> { %v887_v12 = vadd.f32 %v885_v44, %v869_v63  ;;  %v888_v13 = vadd.f32 %v886_v25, %v870_v2  ;;  %v905_v14 = vsel %vm273_vm0, %v903_v3, %v904_v4  ;;  %v943_v15 = vmul.f32 %v1626_v61, %v2073_v32  ;;  %v2135_v44 = vld [vmem:[%s1855_s7 + $0x78] sm:$0xff]  ;;  %v2143_v25 = vld [vmem:[%s1855_s7 + $0x80] sm:$0xff] }
  0x58   : >> { %v907_v17 = vsel %vm273_vm0, %v904_v4, %v906_v6  ;;  %v928_v18 = vsel %vm297_vm1, %v926_v9, %v927_v10  ;;  %v930_v21 = vsel %vm297_vm1, %v927_v10, %v929_v7  ;;  %v944_v22 = vmul.f32 %v1626_v61, %v2081_v8  ;;  %v1641_v59 = vld [vmem:[%s2290_s1 + $0x25] ss:$0 sm:$0xff] }
  0x59   : >> { %v910_v23 = vadd.f32 %v905_v14, %v887_v12  ;;  %v911_v24 = vadd.f32 %v907_v17, %v888_v13  ;;  %v945_v26 = vmul.f32 %v1626_v61, %v2087_v43  ;;  %v949_v62 = vrot.slane %v943_v15, 3  ;;  %v1643_v15 = vld [vmem:[%s2290_s1 + $0x26] ss:$0 sm:$0xff] }
  0x5a   : >> { %v950_v27 = vrot.slane %v944_v22, 3  ;;  %v966_v5 = vmul.f32 %v1628_v16, %v2073_v32  ;;  %v967_v28 = vmul.f32 %v1628_v16, %v2081_v8  ;;  %v968_v29 = vmul.f32 %v1628_v16, %v2087_v43 }
  0x5b   : >> { %v933_v30 = vadd.f32 %v928_v18, %v910_v23  ;;  %v934_v33 = vadd.f32 %v930_v21, %v911_v24  ;;  %v952_v34 = vrot.slane %v945_v26, 3  ;;  %v989_v35 = vmul.f32 %v1630_v56, %v2073_v32 }
  0x5c   : >> { %v951_v11 = vsel %vm321_vm2, %v949_v62, %v950_v27  ;;  %v972_v36 = vrot.slane %v966_v5, 4  ;;  %v973_v20 = vrot.slane %v967_v28, 4  ;;  %v975_v37 = vrot.slane %v968_v29, 4  ;;  %v1645_v28 = vld [vmem:[%s2290_s1 + $0x27] ss:$0 sm:$0xff] }
  0x5d   : >> { %v953_v39 = vsel %vm321_vm2, %v950_v27, %v952_v34  ;;  %v956_v40 = vadd.f32 %v951_v11, %v933_v30  ;;  %v990_v41 = vmul.f32 %v1630_v56, %v2081_v8  ;;  %v991_v42 = vmul.f32 %v1630_v56, %v2087_v43 }
  0x5e   : >> { %v957_v46 = vadd.f32 %v953_v39, %v934_v33  ;;  %v974_v47 = vsel %vm345_vm3, %v972_v36, %v973_v20  ;;  %v976_v19 = vsel %vm345_vm3, %v973_v20, %v975_v37  ;;  %v995_v48 = vrot.slane %v989_v35, 5  ;;  %v1647_v35 = vld [vmem:[%s2290_s1 + $0x28] ss:$0 sm:$0xff] }
  0x5f   : >> { %v979_v31 = vadd.f32 %v974_v47, %v956_v40  ;;  %v996_v49 = vrot.slane %v990_v41, 5  ;;  %v998_v50 = vrot.slane %v991_v42, 5  ;;  %v1012_v51 = vmul.f32 %v1632_v38, %v2073_v32 }
  0x60   : >> { %v980_v52 = vadd.f32 %v976_v19, %v957_v46  ;;  %v1013_v53 = vmul.f32 %v1632_v38, %v2081_v8  ;;  %v1014_v54 = vmul.f32 %v1632_v38, %v2087_v43  ;;  %v1041_v57 = vmul.f32 %v1637_v45, %v2135_v44 }
  0x61   : >> { %v997_v60 = vsel %vm369_vm4, %v995_v48, %v996_v49  ;;  %v999_v32 = vsel %vm369_vm4, %v996_v49, %v998_v50  ;;  %v1018_v61 = vrot.slane %v1012_v51, 6  ;;  %v1042_v8 = vmul.f32 %v1637_v45, %v2143_v25  ;;  %v1649_v50 = vld [vmem:[%s2290_s1 + $0x29] ss:$0 sm:$0xff] }
  0x62   : >> { %v1002_v43 = vadd.f32 %v997_v60, %v979_v31  ;;  %v1003_v63 = vadd.f32 %v999_v32, %v980_v52  ;;  %v1019_v2 = vrot.slane %v1013_v53, 6  ;;  %v1021_v3 = vrot.slane %v1014_v54, 6 }
  0x63   : >> { %v1053_v4 = vmul.f32 %v1639_v58, %v2135_v44  ;;  %v1054_v6 = vmul.f32 %v1639_v58, %v2143_v25  ;;  %v1055_v9 = vmul.f32 %v1639_v58, %v2149_v55  ;;  %v1076_v10 = vmul.f32 %v1641_v59, %v2135_v44  ;;  %v1654_v58 = vld [vmem:[%s2290_s1 + $0x2a] ss:$0 sm:$0xff] }
  0x64   : >> { %v1020_v7 = vsel %vm393_vm5, %v1018_v61, %v1019_v2  ;;  %v1022_v12 = vsel %vm393_vm5, %v1019_v2, %v1021_v3  ;;  %v1077_v13 = vmul.f32 %v1641_v59, %v2143_v25  ;;  %v1078_v14 = vmul.f32 %v1641_v59, %v2149_v55 }
  0x65   : >> { %v1025_v16 = vadd.f32 %v1020_v7, %v1002_v43  ;;  %v1026_v17 = vadd.f32 %v1022_v12, %v1003_v63  ;;  %v1059_v18 = vrot.slane %v1053_v4, 1  ;;  %v1060_v21 = vrot.slane %v1054_v6, 1  ;;  %v1656_v12 = vld [vmem:[%s2290_s1 + $0x2b] ss:$0 sm:$0xff] }
  0x66   : >> { %v1062_v22 = vrot.slane %v1055_v9, 1  ;;  %v1082_v56 = vrot.slane %v1076_v10, 2  ;;  %v1083_v23 = vrot.slane %v1077_v13, 2  ;;  %v1085_v24 = vrot.slane %v1078_v14, 2  ;;  %v2211_v10 = vld [vmem:[%s1855_s7 + $0xa0] sm:$0x3f] }
  0x67   : >> { %v1043_v26 = vadd.f32 %v1041_v57, %v1025_v16  ;;  %v1044_v62 = vadd.f32 %v1042_v8, %v1026_v17  ;;  %v1061_v27 = vsel %vm273_vm0, %v1059_v18, %v1060_v21  ;;  %v1099_v5 = vmul.f32 %v1643_v15, %v2135_v44  ;;  %v2197_v57 = vld [vmem:[%s1855_s7 + $0x90] sm:$0xff]  ;;  %v2205_v8 = vld [vmem:[%s1855_s7 + $0x98] sm:$0xff]  ;;  %v1658_v13 = vld [vmem:[%s2290_s1 + $0x2c] ss:$0 sm:$0xff] }
  0x68   : >> { %v1063_v29 = vsel %vm273_vm0, %v1060_v21, %v1062_v22  ;;  %v1084_v30 = vsel %vm297_vm1, %v1082_v56, %v1083_v23  ;;  %v1086_v33 = vsel %vm297_vm1, %v1083_v23, %v1085_v24  ;;  %v1100_v34 = vmul.f32 %v1643_v15, %v2143_v25 }
  0x69   : >> { %v1066_v11 = vadd.f32 %v1061_v27, %v1043_v26  ;;  %v1067_v36 = vadd.f32 %v1063_v29, %v1044_v62  ;;  %v1101_v20 = vmul.f32 %v1643_v15, %v2149_v55  ;;  %v1105_v37 = vrot.slane %v1099_v5, 3  ;;  %v1660_v5 = vld [vmem:[%s2290_s1 + $0x2d] ss:$0 sm:$0xff] }
  0x6a   : >> { %v1106_v38 = vrot.slane %v1100_v34, 3  ;;  %v1122_v39 = vmul.f32 %v1645_v28, %v2135_v44  ;;  %v1123_v40 = vmul.f32 %v1645_v28, %v2143_v25  ;;  %v1124_v41 = vmul.f32 %v1645_v28, %v2149_v55 }
  0x6b   : >> { %v1089_v42 = vadd.f32 %v1084_v30, %v1066_v11  ;;  %v1090_v45 = vadd.f32 %v1086_v33, %v1067_v36  ;;  %v1108_v46 = vrot.slane %v1101_v20, 3  ;;  %v1145_v47 = vmul.f32 %v1647_v35, %v2135_v44 }
  0x6c   : >> { %v1107_v19 = vsel %vm321_vm2, %v1105_v37, %v1106_v38  ;;  %v1128_v48 = vrot.slane %v1122_v39, 4  ;;  %v1129_v31 = vrot.slane %v1123_v40, 4  ;;  %v1131_v49 = vrot.slane %v1124_v41, 4  ;;  %v1662_v40 = vld [vmem:[%s2290_s1 + $0x2e] ss:$0 sm:$0xff] }
  0x6d   : >> { %v1109_v51 = vsel %vm321_vm2, %v1106_v38, %v1108_v46  ;;  %v1112_v52 = vadd.f32 %v1107_v19, %v1089_v42  ;;  %v1146_v53 = vmul.f32 %v1647_v35, %v2143_v25  ;;  %v1147_v54 = vmul.f32 %v1647_v35, %v2149_v55 }
  0x6e   : >> { %v1113_v59 = vadd.f32 %v1109_v51, %v1090_v45  ;;  %v1130_v60 = vsel %vm345_vm3, %v1128_v48, %v1129_v31  ;;  %v1132_v32 = vsel %vm345_vm3, %v1129_v31, %v1131_v49  ;;  %v1151_v61 = vrot.slane %v1145_v47, 5  ;;  %v1664_v47 = vld [vmem:[%s2290_s1 + $0x2f] ss:$0 sm:$0xff] }
  0x6f   : >> { %v1135_v43 = vadd.f32 %v1130_v60, %v1112_v52  ;;  %v1152_v63 = vrot.slane %v1146_v53, 5  ;;  %v1154_v2 = vrot.slane %v1147_v54, 5  ;;  %v1168_v3 = vmul.f32 %v1649_v50, %v2135_v44 }
  0x70   : >> { %v1136_v4 = vadd.f32 %v1132_v32, %v1113_v59  ;;  %v1169_v6 = vmul.f32 %v1649_v50, %v2143_v25  ;;  %v1170_v9 = vmul.f32 %v1649_v50, %v2149_v55  ;;  %v1197_v7 = vmul.f32 %v1654_v58, %v2197_v57 }
  0x71   : >> { %v1153_v14 = vsel %vm369_vm4, %v1151_v61, %v1152_v63  ;;  %v1155_v44 = vsel %vm369_vm4, %v1152_v63, %v1154_v2  ;;  %v1174_v15 = vrot.slane %v1168_v3, 6  ;;  %v1198_v25 = vmul.f32 %v1654_v58, %v2205_v8  ;;  %v1666_v2 = vld [vmem:[%s2290_s1 + $0x30] ss:$0 sm:$0xff] }
  0x72   : >> { %v1158_v55 = vadd.f32 %v1153_v14, %v1135_v43  ;;  %v1159_v16 = vadd.f32 %v1155_v44, %v1136_v4  ;;  %v1175_v17 = vrot.slane %v1169_v6, 6  ;;  %v1177_v18 = vrot.slane %v1170_v9, 6 }
  0x73   : >> { %v1209_v21 = vmul.f32 %v1656_v12, %v2197_v57  ;;  %v1210_v22 = vmul.f32 %v1656_v12, %v2205_v8  ;;  %v1211_v56 = vmul.f32 %v1656_v12, %v2211_v10  ;;  %v1232_v23 = vmul.f32 %v1658_v13, %v2197_v57 }
  0x74   : >> { %v1176_v24 = vsel %vm393_vm5, %v1174_v15, %v1175_v17  ;;  %v1178_v26 = vsel %vm393_vm5, %v1175_v17, %v1177_v18  ;;  %v1233_v62 = vmul.f32 %v1658_v13, %v2205_v8  ;;  %v1234_v27 = vmul.f32 %v1658_v13, %v2211_v10 }
  0x75   : >> { %v1181_v28 = vadd.f32 %v1176_v24, %v1158_v55  ;;  %v1182_v29 = vadd.f32 %v1178_v26, %v1159_v16  ;;  %v1215_v30 = vrot.slane %v1209_v21, 1  ;;  %v1216_v33 = vrot.slane %v1210_v22, 1 }
  0x76   : >> { %v1218_v34 = vrot.slane %v1211_v56, 1  ;;  %v1238_v35 = vrot.slane %v1232_v23, 2  ;;  %v1239_v11 = vrot.slane %v1233_v62, 2  ;;  %v1241_v36 = vrot.slane %v1234_v27, 2 }
  0x77   : >> { %v1199_v20 = vadd.f32 %v1197_v7, %v1181_v28  ;;  %v1200_v37 = vadd.f32 %v1198_v25, %v1182_v29  ;;  %v1217_v38 = vsel %vm273_vm0, %v1215_v30, %v1216_v33  ;;  %v1255_v39 = vmul.f32 %v1660_v5, %v2197_v57 }
  0x78   : >> { %v1219_v41 = vsel %vm273_vm0, %v1216_v33, %v1218_v34  ;;  %v1240_v42 = vsel %vm297_vm1, %v1238_v35, %v1239_v11  ;;  %v1242_v45 = vsel %vm297_vm1, %v1239_v11, %v1241_v36  ;;  %v1256_v46 = vmul.f32 %v1660_v5, %v2205_v8 }
  0x79   : >> { %v1222_v19 = vadd.f32 %v1217_v38, %v1199_v20  ;;  %v1223_v48 = vadd.f32 %v1219_v41, %v1200_v37  ;;  %v1257_v31 = vmul.f32 %v1660_v5, %v2211_v10  ;;  %v1261_v49 = vrot.slane %v1255_v39, 3 }
  0x7a   : >> { %v1262_v50 = vrot.slane %v1256_v46, 3  ;;  %v1278_v51 = vmul.f32 %v1662_v40, %v2197_v57  ;;  %v1279_v52 = vmul.f32 %v1662_v40, %v2205_v8  ;;  %v1280_v53 = vmul.f32 %v1662_v40, %v2211_v10 }
  0x7b   : >> { %v1245_v54 = vadd.f32 %v1240_v42, %v1222_v19  ;;  %v1246_v58 = vadd.f32 %v1242_v45, %v1223_v48  ;;  %v1264_v59 = vrot.slane %v1257_v31, 3  ;;  %v1301_v60 = vmul.f32 %v1664_v47, %v2197_v57 }
  0x7c   : >> { %v1263_v32 = vsel %vm321_vm2, %v1261_v49, %v1262_v50  ;;  %v1284_v61 = vrot.slane %v1278_v51, 4  ;;  %v1285_v43 = vrot.slane %v1279_v52, 4  ;;  %v1287_v63 = vrot.slane %v1280_v53, 4 }
  0x7d   : >> { %v1265_v3 = vsel %vm321_vm2, %v1262_v50, %v1264_v59  ;;  %v1268_v4 = vadd.f32 %v1263_v32, %v1245_v54  ;;  %v1302_v6 = vmul.f32 %v1664_v47, %v2205_v8  ;;  %v1303_v9 = vmul.f32 %v1664_v47, %v2211_v10 }
  0x7e   : >> { %v1269_v7 = vadd.f32 %v1265_v3, %v1246_v58  ;;  %v1286_v12 = vsel %vm345_vm3, %v1284_v61, %v1285_v43  ;;  %v1288_v13 = vsel %vm345_vm3, %v1285_v43, %v1287_v63  ;;  %v1307_v14 = vrot.slane %v1301_v60, 5 }
  0x7f   : >> { %v1291_v44 = vadd.f32 %v1286_v12, %v1268_v4  ;;  %v1308_v15 = vrot.slane %v1302_v6, 5  ;;  %v1310_v25 = vrot.slane %v1303_v9, 5  ;;  %v1324_v55 = vmul.f32 %v1666_v2, %v2197_v57 }
  0x80   : >> { %v1292_v16 = vadd.f32 %v1288_v13, %v1269_v7  ;;  %v1325_v17 = vmul.f32 %v1666_v2, %v2205_v8  ;;  %v1326_v18 = vmul.f32 %v1666_v2, %v2211_v10 }
  0x81   : >> { %v1309_v21 = vsel %vm369_vm4, %v1307_v14, %v1308_v15  ;;  %v1311_v22 = vsel %vm369_vm4, %v1308_v15, %v1310_v25  ;;  %v1330_v56 = vrot.slane %v1324_v55, 6 }
  0x82   : >> { %v1314_v23 = vadd.f32 %v1309_v21, %v1291_v44  ;;  %v1315_v24 = vadd.f32 %v1311_v22, %v1292_v16  ;;  %v1331_v26 = vrot.slane %v1325_v17, 6  ;;  %v1333_v62 = vrot.slane %v1326_v18, 6 }
  0x84   : >> { %v1332_v27 = vsel %vm393_vm5, %v1330_v56, %v1331_v26  ;;  %v1334_v57 = vsel %vm393_vm5, %v1331_v26, %v1333_v62 }
  0x85   : >> { %v1337_v5 = vadd.f32 %v1332_v27, %v1314_v23  ;;  %v1338_v28 = vadd.f32 %v1334_v57, %v1315_v24 }
  0x87   : >> { %v1680_v8 = vpack.c.bf16 %v1338_v28, %v1337_v5  ;;  %v1352_v29 = vadd.f32 %v1338_v28, %v1337_v5  ;;  %v1360_v10 = vmul.f32 %v1337_v5, %v1337_v5  ;;  %v1361_v30 = vmul.f32 %v1338_v28, %v1338_v28 }
  0x89   : >> { %1681 = vst [vmem:[%s1349_s6] sm:$0xff] %v1680_v8   ;;  %v1353_v33 = vrot.slane %v1352_v29, 4  ;;  %v1362_v34 = vadd.f32 %v1361_v30, %v1360_v10 }
  0x8b   : >> { %v1354_v35 = vadd.f32 %v1353_v33, %v1352_v29  ;;  %v1363_v11 = vrot.slane %v1362_v34, 4 }
  0x8d   : >> { %v1355_v36 = vrot.slane %v1354_v35, 2  ;;  %v1364_v20 = vadd.f32 %v1363_v11, %v1362_v34 }
  0x8f   : >> { %v1356_v37 = vadd.f32 %v1355_v36, %v1354_v35  ;;  %v1365_v38 = vrot.slane %v1364_v20, 2 }
  0x91   : >> { %v1357_v39 = vrot.slane %v1356_v37, 1  ;;  %v1366_v40 = vadd.f32 %v1365_v38, %v1364_v20 }
  0x93   : >> { %v1358_v41 = vadd.f32 %v1357_v39, %v1356_v37  ;;  %v1367_v42 = vrot.slane %v1366_v40, 1 }
  0x95   : >> { %v1359_v45 = vadd.f32 %v1773_v1, %v1358_v41   ;;  %v1368_v46 = vadd.f32 %v1367_v42, %v1366_v40  ;;  %239 = sbr.rel (!%p237_p5) target bundleno = 16 (0x10), region = 136 }
  0x97   : >> { %v1369_v47 = vadd.f32 %v1769_v0, %v1368_v46   ;;  %v2294_v1 = vmov %v1359_v45  ;;  %1370 = vst [vmem:[%s1830_s27] sm:$0x1] (%p237_p5), %v1359_v45 }
  0x99   : >> { %v2293_v0 = vmov %v1369_v47  ;;  %1371 = vst [vmem:[%s1830_s27 + $0x1] sm:$0x1] (%p237_p5), %v1369_v47 }
  0x9a PF: > { %s14_s14 = sadd.s32 1, %s1765_s14   ;;  %s2295_s12 = smov %s1761_s13 }
  0x9b   : > { %p11_p6 = scmp.ge.s32.totalorder %s14_s14, 4   ;;  %s2296_s13 = smov %s2298_s15 }
  0x9d   :  { %13 = sbr.rel (!%p11_p6) target bundleno = 2 (0x2), region = 147 }

</bundles_post_ra>
